<compile_context>
chip_gen: v5e
topology: v5e:2x2
jax: 0.10.0
libtpu: 0.0.40
codegen_flags: <defaults>
</compile_context>

<pallas_src>
import jax
import jax.numpy as jnp
from jax.experimental import pallas as pl
from jax.experimental.pallas import tpu as pltpu

# Logical sizes (match the PyTorch module).
D_IN, D_H1, D_H2, D_OUT = 4500, 512, 90, 10
# Lane/sublane-friendly padded sizes.
D_IN_PAD = 4608      # 4500 -> 36 * 128
D_H2_PAD = 128       # 90   -> 128
D_OUT_PAD = 128      # 10   -> 128
TK = 1152            # K-tile for layer 2; 4608 = 4 * 1152, 1152 = 9 * 128


def fcnet_kernel(x_ref, w2_ref, b2_ref, w3_ref, b3_ref, w4_ref, b4_ref,
                 o_ref, acc_ref):
    k = pl.program_id(0)

    @pl.when(k == 0)
    def _():
        acc_ref[...] = jnp.zeros_like(acc_ref)

    # Layer 2 partial product for this K-tile (bf16 operands, f32 accumulate).
    acc_ref[...] += jnp.dot(x_ref[...], w2_ref[...],
                            preferred_element_type=jnp.float32)

    @pl.when(k == pl.num_programs(0) - 1)
    def _():
        h = acc_ref[...] + b2_ref[...]                                # (B, 512) f32
        h = jnp.dot(h.astype(jnp.bfloat16), w3_ref[...],
                    preferred_element_type=jnp.float32) + b3_ref[...]  # (B, 128) f32
        o_ref[...] = (jnp.dot(h.astype(jnp.bfloat16), w4_ref[...],
                              preferred_element_type=jnp.float32)
                      + b4_ref[...])                                   # (B, 128) f32


def fcnet_forward(x, params):
    """x: (B, 4500) float. params: padded bf16 weights + padded f32 biases."""
    B = x.shape[0]
    Bp = ((B + 7) // 8) * 8   # sublane-align the batch
    xp = jnp.pad(x.astype(jnp.bfloat16),
                 ((0, Bp - B), (0, D_IN_PAD - D_IN)))

    grid_spec = pltpu.PrefetchScalarGridSpec(
        num_scalar_prefetch=0,
        grid=(D_IN_PAD // TK,),
        in_specs=[
            pl.BlockSpec((Bp, TK), lambda k: (0, k)),          # x K-tile
            pl.BlockSpec((TK, D_H1), lambda k: (k, 0)),        # w2 K-tile
            pl.BlockSpec((1, D_H1), lambda k: (0, 0)),         # b2
            pl.BlockSpec((D_H1, D_H2_PAD), lambda k: (0, 0)),  # w3
            pl.BlockSpec((1, D_H2_PAD), lambda k: (0, 0)),     # b3
            pl.BlockSpec((D_H2_PAD, D_OUT_PAD), lambda k: (0, 0)),  # w4
            pl.BlockSpec((1, D_OUT_PAD), lambda k: (0, 0)),    # b4
        ],
        out_specs=pl.BlockSpec((Bp, D_OUT_PAD), lambda k: (0, 0)),
        scratch_shapes=[pltpu.VMEM((Bp, D_H1), jnp.float32)],  # layer-2 accumulator
    )

    out = pl.pallas_call(
        fcnet_kernel,
        out_shape=jax.ShapeDtypeStruct((Bp, D_OUT_PAD), jnp.float32),
        grid_spec=grid_spec,
        compiler_params=pltpu.CompilerParams(
            dimension_semantics=("arbitrary",),   # K is a reduction axis
            vmem_limit_bytes=24 << 20,
        ),
    )(xp, params["w2"], params["b2"], params["w3"], params["b3"],
      params["w4"], params["b4"])

    # TODO(synk): when serving many batches/models, add a leading "parallel"
    # grid axis so weight loads are amortized and v7x's second TC is used.
    return out[:B, :D_OUT]


def init_params(key):
    """torch.nn.Linear-style init (U[-1/sqrt(fan_in), +]), padded + bf16 weights."""
    sizes = [
        ("2", D_IN, D_H1, D_IN_PAD, D_H1),
        ("3", D_H1, D_H2, D_H1, D_H2_PAD),
        ("4", D_H2, D_OUT, D_H2_PAD, D_OUT_PAD),
    ]
    params = {}
    for name, fi, fo, fip, fop in sizes:
        key, kw, kb = jax.random.split(key, 3)
        bound = 1.0 / jnp.sqrt(fi)
        w = jax.random.uniform(kw, (fi, fo), jnp.float32, -bound, bound)
        b = jax.random.uniform(kb, (1, fo), jnp.float32, -bound, bound)
        wp = jnp.zeros((fip, fop), jnp.bfloat16).at[:fi, :fo].set(
            w.astype(jnp.bfloat16))
        bp = jnp.zeros((1, fop), jnp.float32).at[:, :fo].set(b)
        params[f"w{name}"] = wp
        params[f"b{name}"] = bp
    return params


def fcnet_reference_bf16(x, p):
    """Pure-JAX reference with the same bf16 weights / f32 accumulation."""
    xb = x.astype(jnp.bfloat16)
    h = jnp.dot(xb, p["w2"][:D_IN, :],
                preferred_element_type=jnp.float32) + p["b2"]
    h = jnp.dot(h.astype(jnp.bfloat16), p["w3"],
                preferred_element_type=jnp.float32) + p["b3"]
    o = jnp.dot(h.astype(jnp.bfloat16), p["w4"],
                preferred_element_type=jnp.float32) + p["b4"]
    return o[:, :D_OUT]


def fcnet_reference_f32(x, p):
    """Full-f32 reference of the original module semantics (loose check)."""
    w2 = p["w2"][:D_IN, :].astype(jnp.float32)
    w3 = p["w3"][:, :D_H2].astype(jnp.float32)
    w4 = p["w4"][:D_H2, :D_OUT].astype(jnp.float32)
    h = x @ w2 + p["b2"]
    h = h @ w3 + p["b3"][:, :D_H2]
    return h @ w4 + p["b4"][:, :D_OUT]


if __name__ == "__main__":
    key = jax.random.PRNGKey(0)
    key, kx = jax.random.split(key)
    batch = 8
    x = jax.random.normal(kx, (batch, D_IN), jnp.float32)
    params = init_params(key)

    out = jax.jit(fcnet_forward)(x, params)
    out = jax.block_until_ready(out)
    assert out.shape == (batch, D_OUT)

    ref_bf16 = fcnet_reference_bf16(x, params)
    ref_f32 = fcnet_reference_f32(x, params)
    assert jnp.allclose(out, ref_bf16, atol=2e-3, rtol=2e-3)
    assert jnp.allclose(out, ref_f32, atol=5e-2, rtol=5e-2)
    print("KERNEL_OK")
</pallas_src>

<mosaic_0001>
module attributes {stable_mosaic.version = 11 : i64} {
  func.func @fcnet_kernel(%arg0: i32, %arg1: memref<8x1152xbf16, #tpu.memory_space<vmem>>, %arg2: memref<1152x512xbf16, #tpu.memory_space<vmem>>, %arg3: memref<1x512xf32, #tpu.memory_space<vmem>>, %arg4: memref<512x128xbf16, #tpu.memory_space<vmem>>, %arg5: memref<1x128xf32, #tpu.memory_space<vmem>>, %arg6: memref<128x128xbf16, #tpu.memory_space<vmem>>, %arg7: memref<1x128xf32, #tpu.memory_space<vmem>>, %arg8: memref<8x128xf32, #tpu.memory_space<vmem>>, %arg9: memref<8x512xf32, #tpu.memory_space<vmem>>) attributes {dimension_semantics = [#tpu.dimension_semantics<arbitrary>], iteration_bounds = array<i64: 4>, scalar_prefetch = 0 : i64, scratch_operands = 1 : i64, tpu.core_type = #tpu.core_type<tc>, window_params = [{transform_indices = @transform_0, window_bounds = array<i64: 8, 1152>}, {transform_indices = @transform_1, window_bounds = array<i64: 1152, 512>}, {pipeline_mode = #tpu.pipeline_mode<synchronous>, transform_indices = @transform_2, window_bounds = array<i64: 1, 512>}, {pipeline_mode = #tpu.pipeline_mode<synchronous>, transform_indices = @transform_3, window_bounds = array<i64: 512, 128>}, {pipeline_mode = #tpu.pipeline_mode<synchronous>, transform_indices = @transform_4, window_bounds = array<i64: 1, 128>}, {pipeline_mode = #tpu.pipeline_mode<synchronous>, transform_indices = @transform_5, window_bounds = array<i64: 128, 128>}, {pipeline_mode = #tpu.pipeline_mode<synchronous>, transform_indices = @transform_6, window_bounds = array<i64: 1, 128>}, {pipeline_mode = #tpu.pipeline_mode<synchronous>, transform_indices = @transform_7, window_bounds = array<i64: 8, 128>}]} {
    %c0_i32 = arith.constant 0 : i32
    %0 = arith.cmpi eq, %arg0, %c0_i32 : i32
    %1 = arith.extui %0 : i1 to i32
    %c0_i32_0 = arith.constant 0 : i32
    %2 = arith.cmpi ne, %1, %c0_i32_0 : i32
    scf.if %2 {
      %cst_9 = arith.constant 0.000000e+00 : f32
      %12 = vector.broadcast %cst_9 : f32 to vector<8x512xf32>
      %c0_10 = arith.constant 0 : index
      %c0_11 = arith.constant 0 : index
      %13 = vector.load %arg9[%c0_10, %c0_11] : memref<8x512xf32, #tpu.memory_space<vmem>>, vector<8x512xf32>
      tpu.vector_store %arg9[%c0_10, %c0_11], %12 {strides = array<i32>} : memref<8x512xf32, #tpu.memory_space<vmem>>, vector<8x512xf32>,
    } else {
    }
    %c0 = arith.constant 0 : index
    %c0_1 = arith.constant 0 : index
    %3 = vector.load %arg9[%c0, %c0_1] : memref<8x512xf32, #tpu.memory_space<vmem>>, vector<8x512xf32>
    %c0_2 = arith.constant 0 : index
    %c0_3 = arith.constant 0 : index
    %4 = vector.load %arg1[%c0_2, %c0_3] : memref<8x1152xbf16, #tpu.memory_space<vmem>>, vector<8x1152xbf16>
    %c0_4 = arith.constant 0 : index
    %c0_5 = arith.constant 0 : index
    %5 = vector.load %arg2[%c0_4, %c0_5] : memref<1152x512xbf16, #tpu.memory_space<vmem>>, vector<1152x512xbf16>
    %cst = arith.constant dense<0.000000e+00> : vector<8x512xf32>
    %6 = tpu.matmul %4, %5, %cst {dimension_numbers = #tpu.dot_dimension_numbers<[1], [0], [0], [1], [0, 0, 1, 1], [], []>} : vector<8x1152xbf16>, vector<1152x512xbf16>, vector<8x512xf32> -> vector<8x512xf32>
    %7 = arith.addf %3, %6 : vector<8x512xf32>
    %c0_6 = arith.constant 0 : index
    %c0_7 = arith.constant 0 : index
    %8 = vector.load %arg9[%c0_6, %c0_7] : memref<8x512xf32, #tpu.memory_space<vmem>>, vector<8x512xf32>
    tpu.vector_store %arg9[%c0_6, %c0_7], %7 {strides = array<i32>} : memref<8x512xf32, #tpu.memory_space<vmem>>, vector<8x512xf32>,
    %c3_i32 = arith.constant 3 : i32
    %9 = arith.cmpi eq, %arg0, %c3_i32 : i32
    %10 = arith.extui %9 : i1 to i32
    %c0_i32_8 = arith.constant 0 : i32
    %11 = arith.cmpi ne, %10, %c0_i32_8 : i32
    scf.if %11 {
      %c0_9 = arith.constant 0 : index
      %c0_10 = arith.constant 0 : index
      %12 = vector.load %arg9[%c0_9, %c0_10] : memref<8x512xf32, #tpu.memory_space<vmem>>, vector<8x512xf32>
      %c0_11 = arith.constant 0 : index
      %c0_12 = arith.constant 0 : index
      %13 = vector.load %arg3[%c0_11, %c0_12] : memref<1x512xf32, #tpu.memory_space<vmem>>, vector<1x512xf32>
      %14 = vector.broadcast %13 : vector<1x512xf32> to vector<8x512xf32>
      %15 = arith.addf %12, %14 : vector<8x512xf32>
      %16 = arith.truncf %15 : vector<8x512xf32> to vector<8x512xbf16>
      %c0_13 = arith.constant 0 : index
      %c0_14 = arith.constant 0 : index
      %17 = vector.load %arg4[%c0_13, %c0_14] : memref<512x128xbf16, #tpu.memory_space<vmem>>, vector<512x128xbf16>
      %cst_15 = arith.constant dense<0.000000e+00> : vector<8x128xf32>
      %18 = tpu.matmul %16, %17, %cst_15 {dimension_numbers = #tpu.dot_dimension_numbers<[1], [0], [0], [1], [0, 0, 1, 1], [], []>} : vector<8x512xbf16>, vector<512x128xbf16>, vector<8x128xf32> -> vector<8x128xf32>
      %c0_16 = arith.constant 0 : index
      %c0_17 = arith.constant 0 : index
      %19 = vector.load %arg5[%c0_16, %c0_17] : memref<1x128xf32, #tpu.memory_space<vmem>>, vector<1x128xf32>
      %20 = vector.broadcast %19 : vector<1x128xf32> to vector<8x128xf32>
      %21 = arith.addf %18, %20 : vector<8x128xf32>
      %22 = arith.truncf %21 : vector<8x128xf32> to vector<8x128xbf16>
      %c0_18 = arith.constant 0 : index
      %c0_19 = arith.constant 0 : index
      %23 = vector.load %arg6[%c0_18, %c0_19] : memref<128x128xbf16, #tpu.memory_space<vmem>>, vector<128x128xbf16>
      %cst_20 = arith.constant dense<0.000000e+00> : vector<8x128xf32>
      %24 = tpu.matmul %22, %23, %cst_20 {dimension_numbers = #tpu.dot_dimension_numbers<[1], [0], [0], [1], [0, 0, 1, 1], [], []>} : vector<8x128xbf16>, vector<128x128xbf16>, vector<8x128xf32> -> vector<8x128xf32>
      %c0_21 = arith.constant 0 : index
      %c0_22 = arith.constant 0 : index
      %25 = vector.load %arg7[%c0_21, %c0_22] : memref<1x128xf32, #tpu.memory_space<vmem>>, vector<1x128xf32>
      %26 = vector.broadcast %25 : vector<1x128xf32> to vector<8x128xf32>
      %27 = arith.addf %24, %26 : vector<8x128xf32>
      %c0_23 = arith.constant 0 : index
      %c0_24 = arith.constant 0 : index
      %28 = vector.load %arg8[%c0_23, %c0_24] : memref<8x128xf32, #tpu.memory_space<vmem>>, vector<8x128xf32>
      tpu.vector_store %arg8[%c0_23, %c0_24], %27 {strides = array<i32>} : memref<8x128xf32, #tpu.memory_space<vmem>>, vector<8x128xf32>,
    } else {
    }
    return
  }
  func.func @transform_0(%arg0: i32) -> (i32, i32) {
    %c0_i32 = arith.constant 0 : i32
    %c0_i32_0 = arith.constant 0 : i32
    return %c0_i32, %arg0 : i32, i32
  }
  func.func @transform_1(%arg0: i32) -> (i32, i32) {
    %c0_i32 = arith.constant 0 : i32
    %c0_i32_0 = arith.constant 0 : i32
    return %arg0, %c0_i32 : i32, i32
  }
  func.func @transform_2(%arg0: i32) -> (i32, i32) {
    %c0_i32 = arith.constant 0 : i32
    %c0_i32_0 = arith.constant 0 : i32
    %c0_i32_1 = arith.constant 0 : i32
    return %c0_i32, %c0_i32_0 : i32, i32
  }
  func.func @transform_3(%arg0: i32) -> (i32, i32) {
    %c0_i32 = arith.constant 0 : i32
    %c0_i32_0 = arith.constant 0 : i32
    %c0_i32_1 = arith.constant 0 : i32
    return %c0_i32, %c0_i32_0 : i32, i32
  }
  func.func @transform_4(%arg0: i32) -> (i32, i32) {
    %c0_i32 = arith.constant 0 : i32
    %c0_i32_0 = arith.constant 0 : i32
    %c0_i32_1 = arith.constant 0 : i32
    return %c0_i32, %c0_i32_0 : i32, i32
  }
  func.func @transform_5(%arg0: i32) -> (i32, i32) {
    %c0_i32 = arith.constant 0 : i32
    %c0_i32_0 = arith.constant 0 : i32
    %c0_i32_1 = arith.constant 0 : i32
    return %c0_i32, %c0_i32_0 : i32, i32
  }
  func.func @transform_6(%arg0: i32) -> (i32, i32) {
    %c0_i32 = arith.constant 0 : i32
    %c0_i32_0 = arith.constant 0 : i32
    %c0_i32_1 = arith.constant 0 : i32
    return %c0_i32, %c0_i32_0 : i32, i32
  }
  func.func @transform_7(%arg0: i32) -> (i32, i32) {
    %c0_i32 = arith.constant 0 : i32
    %c0_i32_0 = arith.constant 0 : i32
    %c0_i32_1 = arith.constant 0 : i32
    return %c0_i32, %c0_i32_0 : i32, i32
  }
}

</mosaic_0001>

<bundles_post_ra>
// kernel: fcnet_forward.1
= control target key start
LH: loop header
LB: loop body
LE: loop exit
PB: predicated region body
PF: predicated region fallthrough
CT: control target
= control target key end

     0   :  { %12 = vsyncpa [#allocation4], 0  ;;  %s6089_s0 = inlined_call_operand.vmem [shape: bf16[8,4608], index: 0, kind: input, shape index: {}]   ;;  %s6090_s1 = inlined_call_operand.hbm [shape: bf16[4608,512], index: 1, kind: input, shape index: {}]   ;;  %s6091_s2 = inlined_call_operand.hbm [shape: f32[1,512], index: 2, kind: input, shape index: {}]   ;;  %s6092_s3 = inlined_call_operand.hbm [shape: bf16[512,128], index: 3, kind: input, shape index: {}]   ;;  %s6093_s4 = inlined_call_operand.hbm [shape: f32[1,128], index: 4, kind: input, shape index: {}]   ;;  %s6094_s5 = inlined_call_operand.hbm [shape: bf16[128,128], index: 5, kind: input, shape index: {}]   ;;  %s6095_s6 = inlined_call_operand.hbm [shape: f32[1,128], index: 6, kind: input, shape index: {}]   ;;  %s6096_s7 = inlined_call_operand.hbm [shape: f32[8,128], index: 7, kind: output, shape index: {}]  }
   0x1   :  { %14 = vsyncpa [#allocation4 + $0x1], 0 }
   0x2   :  { %15 = vsyncpa [#allocation7], 0 }
   0x3   :  { %16 = vsyncpa [#allocation10], 0 }
   0x4   :  { %17 = vsyncpa [#allocation13], 0 }
   0x5   :  { %18 = vsyncpa [#allocation5], 0  ;;  %s5264_s24 = smov 0   ;;  %s5266_s25 = smov 0  }
   0x6   :  { %s5268_s26 = smov 0   ;;  %s5270_s27 = smov 0  }
   0x7 LB: > { %s219_s30 = sshll.u32 %s6091_s2, 4  ;;  %s5288_s8 = sadd.s32 4294967295, %s5211_s27   ;;  %s5211_s27 = sphi %s5270_s27, %s6104_s27   ;;  %s5207_s26 = sphi %s5268_s26, %s6103_s26   ;;  %s5203_s25 = sphi %s5266_s25, %s6102_s25   ;;  %s5199_s24 = sphi %s5264_s24, %s6101_s24   ;;  %s220_s30 = int_to_ptr.hbm [resolvable:$true] %s219_s30 }
   0x8   : > { %p3182_p0 = scmp.ge.s32.totalorder %s5211_s27, 1  ;;  %p71_p1 = scmp.eq.s32.totalorder %s5288_s8, 0 }
   0x9   : > { %p207_p2 = scmp.lt.s32.totalorder %s5211_s27, 5  ;;  %p3183_p3 = scmp.ne.s32.totalorder %s5288_s8, 0 }
   0xa   : > { %s5213_s10 = smov [#allocation6]   ;;  %s245_s14 = sshll.u32 %s6093_s4, 4  ;;  %s246_s14 = int_to_ptr.hbm [resolvable:$true] %s245_s14 }
   0xb   : > { %p5294_p4 = pnand %p3182_p0, %p207_p2  ;;  %s221_s11 = sshll.u32 %s5213_s10, 4  ;;  %s222_s11 = int_to_ptr.vmem [resolvable:$true] %s221_s11 }
   0xc   : > { %s5214_s16 = smov [#allocation9]   ;;  %s230_s20 = sshll.u32 %s6092_s3, 4  ;;  %s231_s20 = int_to_ptr.hbm [resolvable:$true] %s230_s20 }
   0xd   : > { %p4875_p5 = pneg %p5294_p4  ;;  %s247_s17 = sshll.u32 %s5214_s16, 4  ;;  %s248_s17 = int_to_ptr.vmem [resolvable:$true] %s247_s17 }
   0xe   : > { %s5215_s21 = smov [#allocation8]   ;;  %s256_s29 = sshll.u32 %s6094_s5, 4  ;;  %s257_s29 = int_to_ptr.hbm [resolvable:$true] %s256_s29 }
   0xf   : > { %p5305_p6 = pnand %p4875_p5, %p71_p1  ;;  %s232_s22 = sshll.u32 %s5215_s21, 4  ;;  %s233_s22 = int_to_ptr.vmem [resolvable:$true] %s232_s22 }
  0x10   : > { %s5216_s10 = smov 64   ;;  %s5217_s12 = smov 4  }
  0x11   : > { %4878 = dma.hbm_to_vmem [thread:$0]  (!%p5305_p6), %s220_s30, 64, %s222_s11, [#allocation7]  }
  0x12   : > { %4884 = dma.hbm_to_vmem [thread:$0]  (!%p5305_p6), %s246_s14, 16, %s248_s17, [#allocation10]  }
  0x13   : > { %4881 = dma.hbm_to_vmem [thread:$0]  (!%p5305_p6), %s231_s20, 4096, %s233_s22, [#allocation7], %s5216_s10, %s5216_s10, %s5217_s12  }
  0x14   : > { %s5218_s30 = smov [#allocation11]   ;;  %s271_s16 = sshll.u32 %s6095_s6, 4  ;;  %s272_s16 = int_to_ptr.hbm [resolvable:$true] %s271_s16 }
  0x15   : > { %s258_s11 = sshll.u32 %s5218_s30, 4  ;;  %s5219_s17 = smov [#allocation12]   ;;  %s259_s11 = int_to_ptr.vmem [resolvable:$true] %s258_s11 }
  0x16   : > { %4887 = dma.hbm_to_vmem [thread:$0]  (!%p5305_p6), %s257_s29, 1024, %s259_s11, [#allocation10], %s5216_s10, %s5216_s10, %s5217_s12  }
  0x17   : > { %s273_s18 = sshll.u32 %s5219_s17, 4  ;;  %s5329_s19 = sadd.s32 1, %s5211_s27   ;;  %s274_s18 = int_to_ptr.vmem [resolvable:$true] %s273_s18 }
  0x18   : > { %4890 = dma.hbm_to_vmem [thread:$0]  (!%p5305_p6), %s272_s16, 16, %s274_s18, [#allocation13]  }
  0x19   : > { %s54_s20 = ssub.s32 %s5211_s27, %s5329_s19  ;;  %s57_s21 = sadd.s32 1, %s5207_s26 }
  0x1a   : > { %p55_p7 = scmp.eq.s32.totalorder %s54_s20, 0  ;;  %p64_p8 = scmp.ne.s32.totalorder %s5207_s26, %s5203_s25 }
  0x1b   : > { %p65_p9 = scmp.eq.s32.totalorder %s5211_s27, 0  ;;  %p70_p10 = scmp.ne.s32.totalorder %s5203_s25, %s5199_s24 }
  0x1c   : > { %s5340_s22 = scalar_select %p55_p7, %s5207_s26, %s57_s21  }
  0x1d   : > { %p66_p11 = por %p65_p9, %p64_p8  ;;  %p5344_p12 = por %p71_p1, %p70_p10 }
  0x1e   : > { %p4900_p13 = scmp.lt.s32.totalorder %s5211_s27, 4  ;;  %s293_s15 = sand.u32 1, %s5207_s26  }
  0x1f   : > { %s4847_s28 = smul.u32 2304, %s293_s15  ;;  %s294_s16 = scalar_lea.sflag [#allocation4], %s293_s15 }
  0x20   : > { %s4846_s29 = smul.u32 2304, %s5211_s27  ;;  %p5351_p0 = pnand %p4900_p13, %p66_p11 }
  0x21   : > { %s297_s11 = scalar_lea.vmem [#allocation3], %s4847_s28  ;;  %s5110_s21 = scalar_lea.hbm %s6090_s1, 9216 }
  0x22   : > { %s303_s24 = scalar_lea.hbm %s6090_s1, %s4846_s29  ;;  %s306_s13 = sshll.u32 %s297_s11, 4  ;;  %s307_s13 = int_to_ptr.vmem [resolvable:$true] %s306_s13 }
  0x23   : > { %s304_s14 = sshll.u32 %s303_s24, 4  ;;  %p5107_p5 = pneg %p5351_p0  ;;  %s305_s14 = int_to_ptr.hbm [resolvable:$true] %s304_s14 }
  0x24   : > { %s5103_s17 = sshra.s32 %s305_s14, 4  ;;  %s5104_s17 = int_to_ptr.hbm [resolvable:$true] %s5103_s17 }
  0x25   : > { %s5105_s18 = scalar_lea.hbm %s5104_s17, 2304  ;;  %p5111_p8 = scmp.lt.s32.totalorder %s5104_s17, %s6090_s1 }
  0x26   : > { %p5106_p2 = scmp.ne.s32.totalorder %s5104_s17, %s5105_s18  ;;  %p5112_p9 = scmp.lt.s32.totalorder %s5110_s21, %s5105_s18 }
  0x28   : > { %p5108_p6 = pnand %p5107_p5, %p5106_p2  ;;  %p5113_p10 = por %p5112_p9, %p5111_p8 }
  0x2a   : > { %p5109_p7 = pneg %p5108_p6 }
  0x2c   : > { %p5114_p11 = pnand %p5113_p10, %p5109_p7 }
  0x2e   : > { %5117 = shalt.err (!%p5114_p11)
}
  0x2f   : > { %s5220_s15 = smov 256   ;;  %s5221_s28 = smov 16  }
  0x30   : > { %4894 = dma.hbm_to_vmem [thread:$0]  (!%p5351_p0), %s305_s14, 36864, %s307_s13, %s294_s16, %s5220_s15, %s5220_s15, %s5221_s28  }
  0x31   : > { %318 = sbr.rel (%p5294_p4) target bundleno = 818 (0x332), region = 48  ;;  %s320_s30 = sand.u32 (!%p5294_p4), 1, %s5203_s25  }
  0x32   : > { %s4848_s24 = smul.u32 (!%p5294_p4), 2304, %s320_s30  ;;  %s321_s11 = scalar_lea.sflag (!%p5294_p4), [#allocation4], %s320_s30 }
  0x34   : > { %s5371_s27 = scalar_lea.vmem (!%p5294_p4), [#allocation3], %s4848_s24 }
  0x36   : > { %5178 = dma.done.wait (%p5344_p12), %s321_s11, 36864  }
  0x37   : > { %5180 = vsyncadd (%p5344_p12), %s321_s11, 4294930432 }
  0x38   : > { %5182 = dma.done.wait (%p71_p1), [#allocation7], 4160  }
  0x39   : > { %5184 = vsyncadd (%p71_p1), [#allocation7], 4294963136 }
  0x3a   : > { %5186 = dma.done.wait (%p71_p1), [#allocation10], 1040  }
  0x3b   : > { %5188 = vsyncadd (%p71_p1), [#allocation10], 4294966256 }
  0x3c   : > { %5190 = dma.done.wait (%p71_p1), [#allocation13], 16  }
  0x3d   : > { %5192 = vsyncadd (%p71_p1), [#allocation13], 4294967280  ;;  %s381_s9 = smul.u32 9, %s5288_s8 }
  0x3f   : > { %p382_p4 = scmp.lt.s32.totalorder %s381_s9, 35  ;;  %391 = sbr.rel (%p3183_p3) target bundleno = 73 (0x49), region = 76 }
  0x41   : > { %s6106_s9 = smov (!%p382_p4, %s381_s9), 35 }
  0x42   : > { %s3197_s23 = sshll.u32 %s6106_s9, 2 }
  0x43   : > { %s5393_s14 = scalar_lea.vmem %s6089_s0, %s3197_s23 }
  0x44   : > { %v5222_v0 = vmov 0.0  }
  0x45   : > { %392 = vst [vmem:[#allocation2 + $0x10] sm:$0xff] %v5222_v0 }
  0x46   : > { %393 = vst [vmem:[#allocation2] sm:$0xff] %v5222_v0 }
  0x47   : > { %394 = vst [vmem:[#allocation2 + $0x18] sm:$0xff] %v5222_v0 }
  0x48   : > { %395 = vst [vmem:[#allocation2 + $0x8] sm:$0xff] %v5222_v0 }
  0x49 PF: > { %v3313_v1 = vld [vmem:[%s5371_s27 + $0xe0] sm:$0xf]  ;;  %v4548_v2 = vld [vmem:[%s5371_s27 + $0xec] sm:$0xf0]  ;;  %p4351_p1 = scmp.ne.s32.totalorder %s5288_s8, 3 }
  0x4a   : > { %v3441_v3 = vld [vmem:[%s5371_s27 + $0x1e0] sm:$0xf]  ;;  %v3314_v4 = vor.u32 %v4548_v2, %v3313_v1  ;;  %v4580_v5 = vld [vmem:[%s5371_s27 + $0x1ec] sm:$0xf0] }
  0x4b   : > { %v3569_v6 = vld [vmem:[%s5371_s27 + $0x2e0] sm:$0xf]  ;;  %v4612_v7 = vld [vmem:[%s5371_s27 + $0x2ec] sm:$0xf0]  ;;  %v3442_v8 = vor.u32 %v4580_v5, %v3441_v3 }
  0x4c   : > { %v3570_v9 = vor.u32 %v4612_v7, %v3569_v6  ;;  %v3697_v10 = vld [vmem:[%s5371_s27 + $0x3e0] sm:$0xf]  ;;  %v4644_v11 = vld [vmem:[%s5371_s27 + $0x3ec] sm:$0xf0]  ;;  %2165 = vmatpush.bf16.msra.mxu0 %v3314_v4 }
  0x4d   : > { %v3297_v12 = vld [vmem:[%s5371_s27 + $0xc0] sm:$0xf]  ;;  %v3698_v13 = vor.u32 %v4644_v11, %v3697_v10  ;;  %v4544_v14 = vld [vmem:[%s5371_s27 + $0xcc] sm:$0xf0]  ;;  %2178 = vmatpush.bf16.msra.mxu1 %v3442_v8 }
  0x4e   : > { %v3425_v15 = vld [vmem:[%s5371_s27 + $0x1c0] sm:$0xf]  ;;  %v4576_v16 = vld [vmem:[%s5371_s27 + $0x1cc] sm:$0xf0]  ;;  %2191 = vmatpush.bf16.msra.mxu2 %v3570_v9  ;;  %v3298_v17 = vor.u32 %v4544_v14, %v3297_v12 }
  0x4f   : > { %v3426_v18 = vor.u32 %v4576_v16, %v3425_v15  ;;  %v3553_v19 = vld [vmem:[%s5371_s27 + $0x2c0] sm:$0xf]  ;;  %v4608_v20 = vld [vmem:[%s5371_s27 + $0x2cc] sm:$0xf0]  ;;  %2204 = vmatpush.bf16.msra.mxu3 %v3698_v13 }
  0x50   : > { %v3681_v21 = vld [vmem:[%s5371_s27 + $0x3c0] sm:$0xf]  ;;  %v3554_v22 = vor.u32 %v4608_v20, %v3553_v19  ;;  %v4640_v23 = vld [vmem:[%s5371_s27 + $0x3cc] sm:$0xf0]  ;;  %2166 = vmatpush.bf16.msra.mxu0 %v3298_v17 }
  0x51   : > { %v3281_v24 = vld [vmem:[%s5371_s27 + $0xa0] sm:$0xf]  ;;  %v4540_v25 = vld [vmem:[%s5371_s27 + $0xac] sm:$0xf0]  ;;  %v3682_v26 = vor.u32 %v4640_v23, %v3681_v21  ;;  %2179 = vmatpush.bf16.msra.mxu1 %v3426_v18 }
  0x52   : > { %v3409_v27 = vld [vmem:[%s5371_s27 + $0x1a0] sm:$0xf]  ;;  %v4572_v28 = vld [vmem:[%s5371_s27 + $0x1ac] sm:$0xf0]  ;;  %v3282_v30 = vor.u32 %v4540_v25, %v3281_v24  ;;  %2192 = vmatpush.bf16.msra.mxu2 %v3554_v22 }
  0x53   : > { %v3537_v29 = vld [vmem:[%s5371_s27 + $0x2a0] sm:$0xf]  ;;  %v4604_v31 = vld [vmem:[%s5371_s27 + $0x2ac] sm:$0xf0]  ;;  %v3410_v34 = vor.u32 %v4572_v28, %v3409_v27  ;;  %2205 = vmatpush.bf16.msra.mxu3 %v3682_v26 }
  0x54   : > { %v3665_v32 = vld [vmem:[%s5371_s27 + $0x3a0] sm:$0xf]  ;;  %v4636_v33 = vld [vmem:[%s5371_s27 + $0x3ac] sm:$0xf0]  ;;  %v3538_v35 = vor.u32 %v4604_v31, %v3537_v29  ;;  %2167 = vmatpush.bf16.msra.mxu0 %v3282_v30 }
  0x55   : > { %v3265_v36 = vld [vmem:[%s5371_s27 + $0x80] sm:$0xf]  ;;  %v4536_v37 = vld [vmem:[%s5371_s27 + $0x8c] sm:$0xf0]  ;;  %v3666_v39 = vor.u32 %v4636_v33, %v3665_v32  ;;  %2180 = vmatpush.bf16.msra.mxu1 %v3410_v34 }
  0x56   : > { %v3393_v38 = vld [vmem:[%s5371_s27 + $0x180] sm:$0xf]  ;;  %v4568_v40 = vld [vmem:[%s5371_s27 + $0x18c] sm:$0xf0]  ;;  %v3266_v45 = vor.u32 %v4536_v37, %v3265_v36  ;;  %2193 = vmatpush.bf16.msra.mxu2 %v3538_v35 }
  0x57   : > { %v3521_v41 = vld [vmem:[%s5371_s27 + $0x280] sm:$0xf]  ;;  %v4600_v42 = vld [vmem:[%s5371_s27 + $0x28c] sm:$0xf0]  ;;  %v3394_v46 = vor.u32 %v4568_v40, %v3393_v38  ;;  %2206 = vmatpush.bf16.msra.mxu3 %v3666_v39 }
  0x58   : > { %v3649_v43 = vld [vmem:[%s5371_s27 + $0x380] sm:$0xf]  ;;  %v4632_v44 = vld [vmem:[%s5371_s27 + $0x38c] sm:$0xf0]  ;;  %v3522_v47 = vor.u32 %v4600_v42, %v3521_v41  ;;  %2168 = vmatpush.bf16.msra.mxu0 %v3266_v45 }
  0x59   : > { %v3249_v48 = vld [vmem:[%s5371_s27 + $0x60] sm:$0xf]  ;;  %v4532_v49 = vld [vmem:[%s5371_s27 + $0x6c] sm:$0xf0]  ;;  %v3650_v51 = vor.u32 %v4632_v44, %v3649_v43  ;;  %2181 = vmatpush.bf16.msra.mxu1 %v3394_v46 }
  0x5a   : > { %v3377_v50 = vld [vmem:[%s5371_s27 + $0x160] sm:$0xf]  ;;  %v4564_v52 = vld [vmem:[%s5371_s27 + $0x16c] sm:$0xf0]  ;;  %v3250_v57 = vor.u32 %v4532_v49, %v3249_v48  ;;  %2194 = vmatpush.bf16.msra.mxu2 %v3522_v47 }
  0x5b   : > { %v3505_v53 = vld [vmem:[%s5371_s27 + $0x260] sm:$0xf]  ;;  %v4596_v54 = vld [vmem:[%s5371_s27 + $0x26c] sm:$0xf0]  ;;  %v3378_v58 = vor.u32 %v4564_v52, %v3377_v50  ;;  %2207 = vmatpush.bf16.msra.mxu3 %v3650_v51 }
  0x5c   : > { %v3633_v55 = vld [vmem:[%s5371_s27 + $0x360] sm:$0xf]  ;;  %v4628_v56 = vld [vmem:[%s5371_s27 + $0x36c] sm:$0xf0]  ;;  %v3506_v59 = vor.u32 %v4596_v54, %v3505_v53  ;;  %2169 = vmatpush.bf16.msra.mxu0 %v3250_v57 }
  0x5d   : > { %v3233_v60 = vld [vmem:[%s5371_s27 + $0x40] sm:$0xf]  ;;  %v4528_v61 = vld [vmem:[%s5371_s27 + $0x4c] sm:$0xf0]  ;;  %v3634_v63 = vor.u32 %v4628_v56, %v3633_v55  ;;  %2182 = vmatpush.bf16.msra.mxu1 %v3378_v58 }
  0x5e   : > { %v3361_v62 = vld [vmem:[%s5371_s27 + $0x140] sm:$0xf]  ;;  %v4560_v0 = vld [vmem:[%s5371_s27 + $0x14c] sm:$0xf0]  ;;  %v3234_v5 = vor.u32 %v4528_v61, %v3233_v60  ;;  %2195 = vmatpush.bf16.msra.mxu2 %v3506_v59  ;;  %v401_v59 = vld [vmem:[%s5393_s14 + $0x8] sm:$0xff] }
  0x5f   : > { %v3489_v1 = vld [vmem:[%s5371_s27 + $0x240] sm:$0xf]  ;;  %v4592_v2 = vld [vmem:[%s5371_s27 + $0x24c] sm:$0xf0]  ;;  %v3362_v6 = vor.u32 %v4560_v0, %v3361_v62  ;;  %2208 = vmatpush.bf16.msra.mxu3 %v3634_v63  ;;  %v700_v0 = vunpack.c.l.b16 %v401_v59 }
  0x60   : > { %v3617_v3 = vld [vmem:[%s5371_s27 + $0x340] sm:$0xf]  ;;  %v4624_v4 = vld [vmem:[%s5371_s27 + $0x34c] sm:$0xf0]  ;;  %v3490_v7 = vor.u32 %v4592_v2, %v3489_v1  ;;  %2170 = vmatpush.bf16.msra.mxu0 %v3234_v5  ;;  %v701_v1 = vunpack.c.h.b16 %v401_v59 }
  0x61   : > { %v3217_v8 = vld [vmem:[%s5371_s27 + $0x20] sm:$0xf]  ;;  %v4524_v9 = vld [vmem:[%s5371_s27 + $0x2c] sm:$0xf0]  ;;  %v3618_v11 = vor.u32 %v4624_v4, %v3617_v3  ;;  %2183 = vmatpush.bf16.msra.mxu1 %v3362_v6  ;;  %v5486_v5 = vpack.c.b16 %v700_v0, %v700_v0 }
  0x62   : > { %v3345_v10 = vld [vmem:[%s5371_s27 + $0x120] sm:$0xf]  ;;  %v4556_v12 = vld [vmem:[%s5371_s27 + $0x12c] sm:$0xf0]  ;;  %v3218_v17 = vor.u32 %v4524_v9, %v3217_v8  ;;  %2196 = vmatpush.bf16.msra.mxu2 %v3490_v7  ;;  %v5489_v7 = vpack.c.b16 %v701_v1, %v701_v1 }
  0x63   : > { %v3473_v13 = vld [vmem:[%s5371_s27 + $0x220] sm:$0xf]  ;;  %v4588_v14 = vld [vmem:[%s5371_s27 + $0x22c] sm:$0xf0]  ;;  %v3346_v20 = vor.u32 %v4556_v12, %v3345_v10  ;;  %2209 = vmatpush.bf16.msra.mxu3 %v3618_v11 }
  0x64   : > { %v3601_v15 = vld [vmem:[%s5371_s27 + $0x320] sm:$0xf]  ;;  %v4620_v16 = vld [vmem:[%s5371_s27 + $0x32c] sm:$0xf0]  ;;  %v3474_v21 = vor.u32 %v4588_v14, %v3473_v13  ;;  %2171 = vmatpush.bf16.msra.mxu0 %v3218_v17 }
  0x65   : > { %v3201_v18 = vld [vmem:[%s5371_s27] sm:$0xf]  ;;  %v4520_v19 = vld [vmem:[%s5371_s27 + $0xc] sm:$0xf0]  ;;  %v3602_v25 = vor.u32 %v4620_v16, %v3601_v15  ;;  %2184 = vmatpush.bf16.msra.mxu1 %v3346_v20 }
  0x66   : > { %v3329_v22 = vld [vmem:[%s5371_s27 + $0x100] sm:$0xf]  ;;  %v4552_v23 = vld [vmem:[%s5371_s27 + $0x10c] sm:$0xf0]  ;;  %v3202_v32 = vor.u32 %v4520_v19, %v3201_v18  ;;  %2197 = vmatpush.bf16.msra.mxu2 %v3474_v21 }
  0x67   : > { %v3457_v24 = vld [vmem:[%s5371_s27 + $0x200] sm:$0xf]  ;;  %v4584_v26 = vld [vmem:[%s5371_s27 + $0x20c] sm:$0xf0]  ;;  %v3330_v36 = vor.u32 %v4552_v23, %v3329_v22  ;;  %2210 = vmatpush.bf16.msra.mxu3 %v3602_v25 }
  0x68   : > { %v3585_v27 = vld [vmem:[%s5371_s27 + $0x300] sm:$0xf]  ;;  %v4616_v28 = vld [vmem:[%s5371_s27 + $0x30c] sm:$0xf0]  ;;  %v3458_v37 = vor.u32 %v4584_v26, %v3457_v24  ;;  %2172 = vmatpush.bf16.msra.mxu0 %v3202_v32 }
  0x69   : > { %v3825_v29 = vld [vmem:[%s5371_s27 + $0x4e0] sm:$0xf]  ;;  %v4676_v30 = vld [vmem:[%s5371_s27 + $0x4ec] sm:$0xf0]  ;;  %v3586_v40 = vor.u32 %v4616_v28, %v3585_v27  ;;  %2185 = vmatpush.bf16.msra.mxu1 %v3330_v36 }
  0x6a   : > { %v3953_v31 = vld [vmem:[%s5371_s27 + $0x5e0] sm:$0xf]  ;;  %v4708_v33 = vld [vmem:[%s5371_s27 + $0x5ec] sm:$0xf0]  ;;  %v3826_v41 = vor.u32 %v4676_v30, %v3825_v29  ;;  %2198 = vmatpush.bf16.msra.mxu2 %v3458_v37 }
  0x6b   : > { %v4081_v34 = vld [vmem:[%s5371_s27 + $0x6e0] sm:$0xf]  ;;  %v4740_v35 = vld [vmem:[%s5371_s27 + $0x6ec] sm:$0xf0]  ;;  %v3954_v42 = vor.u32 %v4708_v33, %v3953_v31  ;;  %2211 = vmatpush.bf16.msra.mxu3 %v3586_v40 }
  0x6c   : > { %v4209_v38 = vld [vmem:[%s5371_s27 + $0x7e0] sm:$0xf]  ;;  %v4772_v39 = vld [vmem:[%s5371_s27 + $0x7ec] sm:$0xf0]  ;;  %v4082_v43 = vor.u32 %v4740_v35, %v4081_v34  ;;  %2217 = vmatpush.bf16.msrb.mxu0 %v3826_v41 }
  0x6d   : > { %v3809_v44 = vld [vmem:[%s5371_s27 + $0x4c0] sm:$0xf]  ;;  %v4672_v45 = vld [vmem:[%s5371_s27 + $0x4cc] sm:$0xf0]  ;;  %v4210_v47 = vor.u32 %v4772_v39, %v4209_v38  ;;  %2230 = vmatpush.bf16.msrb.mxu1 %v3954_v42  ;;  %2199 = vmatmul.bf16.vlgmr.msra.gmra.mxu2 %v5486_v5 }
  0x6e   : > { %v3937_v46 = vld [vmem:[%s5371_s27 + $0x5c0] sm:$0xf]  ;;  %v4704_v48 = vld [vmem:[%s5371_s27 + $0x5cc] sm:$0xf0]  ;;  %v3810_v53 = vor.u32 %v4672_v45, %v3809_v44  ;;  %2243 = vmatpush.bf16.msrb.mxu2 %v4082_v43  ;;  %2212 = vmatmul.bf16.vlgmr.msra.gmra.mxu3 %v5489_v7 }
  0x6f   : > { %v4065_v49 = vld [vmem:[%s5371_s27 + $0x6c0] sm:$0xf]  ;;  %v4736_v50 = vld [vmem:[%s5371_s27 + $0x6cc] sm:$0xf0]  ;;  %v3938_v55 = vor.u32 %v4704_v48, %v3937_v46  ;;  %2256 = vmatpush.bf16.msrb.mxu3 %v4210_v47 }
  0x70   : > { %v4193_v51 = vld [vmem:[%s5371_s27 + $0x7c0] sm:$0xf]  ;;  %v4768_v52 = vld [vmem:[%s5371_s27 + $0x7cc] sm:$0xf0]  ;;  %v4066_v56 = vor.u32 %v4736_v50, %v4065_v49  ;;  %2218 = vmatpush.bf16.msrb.mxu0 %v3810_v53 }
  0x71   : > { %v3793_v54 = vld [vmem:[%s5371_s27 + $0x4a0] sm:$0xf]  ;;  %v4668_v57 = vld [vmem:[%s5371_s27 + $0x4ac] sm:$0xf0]  ;;  %v4194_v60 = vor.u32 %v4768_v52, %v4193_v51  ;;  %2231 = vmatpush.bf16.msrb.mxu1 %v3938_v55 }
  0x72   : > { %v3921_v58 = vld [vmem:[%s5371_s27 + $0x5a0] sm:$0xf]  ;;  %v4700_v61 = vld [vmem:[%s5371_s27 + $0x5ac] sm:$0xf0]  ;;  %v3794_v4 = vor.u32 %v4668_v57, %v3793_v54  ;;  %2244 = vmatpush.bf16.msrb.mxu2 %v4066_v56 }
  0x73   : > { %v4049_v62 = vld [vmem:[%s5371_s27 + $0x6a0] sm:$0xf]  ;;  %v4732_v63 = vld [vmem:[%s5371_s27 + $0x6ac] sm:$0xf0]  ;;  %v3922_v8 = vor.u32 %v4700_v61, %v3921_v58  ;;  %2257 = vmatpush.bf16.msrb.mxu3 %v4194_v60 }
  0x74   : > { %v4177_v2 = vld [vmem:[%s5371_s27 + $0x7a0] sm:$0xf]  ;;  %v4764_v3 = vld [vmem:[%s5371_s27 + $0x7ac] sm:$0xf0]  ;;  %v4050_v9 = vor.u32 %v4732_v63, %v4049_v62  ;;  %2219 = vmatpush.bf16.msrb.mxu0 %v3794_v4  ;;  %v403_v4 = vld [vmem:[%s5393_s14 + $0x18] sm:$0xff] }
  0x75   : > { %v400_v6 = vld [vmem:[%s5393_s14] sm:$0xff]  ;;  %v4664_v11 = vld [vmem:[%s5371_s27 + $0x48c] sm:$0xf0]  ;;  %v4178_v15 = vor.u32 %v4764_v3, %v4177_v2  ;;  %2232 = vmatpush.bf16.msrb.mxu1 %v3922_v8 }
  0x76   : > { %v3777_v10 = vld [vmem:[%s5371_s27 + $0x480] sm:$0xf]  ;;  %v698_v13 = vunpack.c.l.b16 %v400_v6  ;;  %v699_v14 = vunpack.c.h.b16 %v400_v6  ;;  %v4696_v16 = vld [vmem:[%s5371_s27 + $0x58c] sm:$0xf0]  ;;  %2245 = vmatpush.bf16.msrb.mxu2 %v4050_v9 }
  0x77   : > { %v3905_v12 = vld [vmem:[%s5371_s27 + $0x580] sm:$0xf]  ;;  %v4728_v18 = vld [vmem:[%s5371_s27 + $0x68c] sm:$0xf0]  ;;  %v3778_v23 = vor.u32 %v4664_v11, %v3777_v10  ;;  %2258 = vmatpush.bf16.msrb.mxu3 %v4178_v15  ;;  %v3315_v15 = vld [vmem:[%s5371_s27 + $0xf0] sm:$0xf0] }
  0x78   : > { %v4033_v17 = vld [vmem:[%s5371_s27 + $0x680] sm:$0xf]  ;;  %v4760_v20 = vld [vmem:[%s5371_s27 + $0x78c] sm:$0xf0]  ;;  %v5500_v21 = vpack.c.b16 %v698_v13, %v698_v13  ;;  %v5503_v22 = vpack.c.b16 %v699_v14, %v699_v14  ;;  %v3906_v24 = vor.u32 %v4696_v16, %v3905_v12  ;;  %v4546_v13 = vld [vmem:[%s5371_s27 + $0xe4] sm:$0xf] }
  0x79   : > { %v4161_v19 = vld [vmem:[%s5371_s27 + $0x780] sm:$0xf]  ;;  %v4034_v25 = vor.u32 %v4728_v18, %v4033_v17  ;;  %v4660_v27 = vld [vmem:[%s5371_s27 + $0x46c] sm:$0xf0]  ;;  %2220 = vmatpush.bf16.msrb.mxu0 %v3778_v23  ;;  %v4578_v16 = vld [vmem:[%s5371_s27 + $0x1e4] sm:$0xf]  ;;  %v704_v18 = vunpack.c.l.b16 %v403_v4 }
  0x7a   : > { %v3761_v26 = vld [vmem:[%s5371_s27 + $0x460] sm:$0xf]  ;;  %v4162_v29 = vor.u32 %v4760_v20, %v4161_v19  ;;  %v4692_v30 = vld [vmem:[%s5371_s27 + $0x56c] sm:$0xf0]  ;;  %2173 = vmatmul.bf16.vlgmr.msra.gmra.mxu0 %v5500_v21  ;;  %2186 = vmatmul.bf16.vlgmr.msra.gmra.mxu1 %v5503_v22  ;;  %v3443_v17 = vld [vmem:[%s5371_s27 + $0x1f0] sm:$0xf0] }
  0x7b   : > { %v3889_v28 = vld [vmem:[%s5371_s27 + $0x560] sm:$0xf]  ;;  %v4724_v32 = vld [vmem:[%s5371_s27 + $0x66c] sm:$0xf0]  ;;  %v3762_v35 = vor.u32 %v4660_v27, %v3761_v26  ;;  %2233 = vmatpush.bf16.msrb.mxu1 %v3906_v24  ;;  %2246 = vmatpush.bf16.msrb.mxu2 %v4034_v25  ;;  %v4610_v23 = vld [vmem:[%s5371_s27 + $0x2e4] sm:$0xf]  ;;  %v705_v26 = vunpack.c.h.b16 %v403_v4 }
  0x7c   : > { %v4017_v31 = vld [vmem:[%s5371_s27 + $0x660] sm:$0xf]  ;;  %v4756_v34 = vld [vmem:[%s5371_s27 + $0x76c] sm:$0xf0]  ;;  %v3890_v36 = vor.u32 %v4692_v30, %v3889_v28  ;;  %2259 = vmatpush.bf16.msrb.mxu3 %v4162_v29  ;;  %v3571_v24 = vld [vmem:[%s5371_s27 + $0x2f0] sm:$0xf0]  ;;  %v3318_v30 = vor.u32 %v4546_v13, %v3315_v15 }
  0x7d   : > { %v4145_v33 = vld [vmem:[%s5371_s27 + $0x760] sm:$0xf]  ;;  %v4018_v37 = vor.u32 %v4724_v32, %v4017_v31  ;;  %v4656_v39 = vld [vmem:[%s5371_s27 + $0x44c] sm:$0xf0]  ;;  %2221 = vmatpush.bf16.msrb.mxu0 %v3762_v35  ;;  %v3446_v31 = vor.u32 %v4578_v16, %v3443_v17  ;;  %v3574_v35 = vor.u32 %v4610_v23, %v3571_v24  ;;  %v3523_v4 = vld [vmem:[%s5371_s27 + $0x290] sm:$0xf0] }
  0x7e   : > { %v3745_v38 = vld [vmem:[%s5371_s27 + $0x440] sm:$0xf]  ;;  %v4146_v41 = vor.u32 %v4756_v34, %v4145_v33  ;;  %v4688_v42 = vld [vmem:[%s5371_s27 + $0x54c] sm:$0xf0]  ;;  %v4542_v34 = vld [vmem:[%s5371_s27 + $0xc4] sm:$0xf] }
  0x7f   : > { %v3873_v40 = vld [vmem:[%s5371_s27 + $0x540] sm:$0xf]  ;;  %v4720_v44 = vld [vmem:[%s5371_s27 + $0x64c] sm:$0xf0]  ;;  %v3746_v47 = vor.u32 %v4656_v39, %v3745_v38  ;;  %2234 = vmatpush.bf16.msrb.mxu1 %v3890_v36  ;;  %2247 = vmatpush.bf16.msrb.mxu2 %v4018_v37  ;;  %v3299_v36 = vld [vmem:[%s5371_s27 + $0xd0] sm:$0xf0]  ;;  %v5555_v39 = vpack.c.b16 %v704_v18, %v704_v18 }
  0x80   : > { %v4001_v43 = vld [vmem:[%s5371_s27 + $0x640] sm:$0xf]  ;;  %v4752_v46 = vld [vmem:[%s5371_s27 + $0x74c] sm:$0xf0]  ;;  %v3874_v48 = vor.u32 %v4688_v42, %v3873_v40  ;;  %2260 = vmatpush.bf16.msrb.mxu3 %v4146_v41  ;;  %v4574_v37 = vld [vmem:[%s5371_s27 + $0x1c4] sm:$0xf] }
  0x81   : > { %v4129_v45 = vld [vmem:[%s5371_s27 + $0x740] sm:$0xf]  ;;  %v4002_v49 = vor.u32 %v4720_v44, %v4001_v43  ;;  %v4652_v51 = vld [vmem:[%s5371_s27 + $0x42c] sm:$0xf0]  ;;  %2222 = vmatpush.bf16.msrb.mxu0 %v3746_v47  ;;  %v3427_v38 = vld [vmem:[%s5371_s27 + $0x1d0] sm:$0xf0]  ;;  %v5561_v43 = vpack.c.b16 %v705_v26, %v705_v26 }
  0x82   : > { %v3729_v50 = vld [vmem:[%s5371_s27 + $0x420] sm:$0xf]  ;;  %v4130_v53 = vor.u32 %v4752_v46, %v4129_v45  ;;  %v4684_v54 = vld [vmem:[%s5371_s27 + $0x52c] sm:$0xf0]  ;;  %v4606_v40 = vld [vmem:[%s5371_s27 + $0x2c4] sm:$0xf]  ;;  %v3302_v46 = vor.u32 %v4542_v34, %v3299_v36  ;;  %v3430_v47 = vor.u32 %v4574_v37, %v3427_v38 }
  0x83   : > { %v3857_v52 = vld [vmem:[%s5371_s27 + $0x520] sm:$0xf]  ;;  %v4716_v56 = vld [vmem:[%s5371_s27 + $0x62c] sm:$0xf0]  ;;  %v3730_v60 = vor.u32 %v4652_v51, %v3729_v50  ;;  %2235 = vmatpush.bf16.msrb.mxu1 %v3874_v48  ;;  %2248 = vmatpush.bf16.msrb.mxu2 %v4002_v49  ;;  %v3555_v41 = vld [vmem:[%s5371_s27 + $0x2d0] sm:$0xf0] }
  0x84   : > { %v3985_v55 = vld [vmem:[%s5371_s27 + $0x620] sm:$0xf]  ;;  %v4748_v58 = vld [vmem:[%s5371_s27 + $0x72c] sm:$0xf0]  ;;  %v3858_v0 = vor.u32 %v4684_v54, %v3857_v52  ;;  %2261 = vmatpush.bf16.msrb.mxu3 %v4130_v53  ;;  %v4538_v50 = vld [vmem:[%s5371_s27 + $0xa4] sm:$0xf]  ;;  %v3558_v51 = vor.u32 %v4606_v40, %v3555_v41 }
  0x85   : > { %v4113_v57 = vld [vmem:[%s5371_s27 + $0x720] sm:$0xf]  ;;  %v4648_v61 = vld [vmem:[%s5371_s27 + $0x40c] sm:$0xf0]  ;;  %v3986_v1 = vor.u32 %v4716_v56, %v3985_v55  ;;  %2223 = vmatpush.bf16.msrb.mxu0 %v3730_v60  ;;  %v3283_v52 = vld [vmem:[%s5371_s27 + $0xb0] sm:$0xf0] }
  0x86   : > { %v3713_v59 = vld [vmem:[%s5371_s27 + $0x400] sm:$0xf]  ;;  %v4680_v63 = vld [vmem:[%s5371_s27 + $0x50c] sm:$0xf0]  ;;  %v4114_v6 = vor.u32 %v4748_v58, %v4113_v57  ;;  %v4570_v53 = vld [vmem:[%s5371_s27 + $0x1a4] sm:$0xf]  ;;  %v3286_v58 = vor.u32 %v4538_v50, %v3283_v52 }
  0x87   : > { %v3841_v62 = vld [vmem:[%s5371_s27 + $0x500] sm:$0xf]  ;;  %v4712_v3 = vld [vmem:[%s5371_s27 + $0x60c] sm:$0xf0]  ;;  %v3714_v14 = vor.u32 %v4648_v61, %v3713_v59  ;;  %2236 = vmatpush.bf16.msrb.mxu1 %v3858_v0  ;;  %2249 = vmatpush.bf16.msrb.mxu2 %v3986_v1  ;;  %v3411_v54 = vld [vmem:[%s5371_s27 + $0x1b0] sm:$0xf0] }
  0x88   : > { %v3969_v2 = vld [vmem:[%s5371_s27 + $0x600] sm:$0xf]  ;;  %v4744_v9 = vld [vmem:[%s5371_s27 + $0x70c] sm:$0xf0]  ;;  %v3842_v19 = vor.u32 %v4680_v63, %v3841_v62  ;;  %2262 = vmatpush.bf16.msrb.mxu3 %v4114_v6  ;;  %v4602_v55 = vld [vmem:[%s5371_s27 + $0x2a4] sm:$0xf]  ;;  %v3414_v59 = vor.u32 %v4570_v53, %v3411_v54 }
  0x89   : > { %v4097_v8 = vld [vmem:[%s5371_s27 + $0x700] sm:$0xf]  ;;  %v402_v10 = vld [vmem:[%s5393_s14 + $0x10] sm:$0xff]  ;;  %v3970_v20 = vor.u32 %v4712_v3, %v3969_v2  ;;  %2224 = vmatpush.bf16.msrb.mxu0 %v3714_v14  ;;  %v4534_v62 = vld [vmem:[%s5371_s27 + $0x84] sm:$0xf] }
  0x8a   : > { %v4337_v11 = vld [vmem:[%s5371_s27 + $0x8e0] sm:$0xf]  ;;  %v4804_v12 = vld [vmem:[%s5371_s27 + $0x8ec] sm:$0xf0]  ;;  %v702_v25 = vunpack.c.l.b16 %v402_v10  ;;  %v4098_v27 = vor.u32 %v4744_v9, %v4097_v8  ;;  %v703_v29 = vunpack.c.h.b16 %v402_v10  ;;  %v3539_v56 = vld [vmem:[%s5371_s27 + $0x2b0] sm:$0xf0] }
  0x8b   : > { %v4338_v28 = vor.u32 %v4804_v12, %v4337_v11  ;;  %v4321_v32 = vld [vmem:[%s5371_s27 + $0x8c0] sm:$0xf]  ;;  %v4800_v33 = vld [vmem:[%s5371_s27 + $0x8cc] sm:$0xf0]  ;;  %2237 = vmatpush.bf16.msrb.mxu1 %v3842_v19  ;;  %2250 = vmatpush.bf16.msrb.mxu2 %v3970_v20  ;;  %v3542_v63 = vor.u32 %v4602_v55, %v3539_v56  ;;  %v3267_v0 = vld [vmem:[%s5371_s27 + $0x90] sm:$0xf0] }
  0x8c   : > { %v5559_v42 = vpack.c.b16 %v702_v25, %v702_v25  ;;  %2263 = vmatpush.bf16.msrb.mxu3 %v4098_v27  ;;  %v4322_v44 = vor.u32 %v4800_v33, %v4321_v32  ;;  %v5563_v45 = vpack.c.b16 %v703_v29, %v703_v29  ;;  %v4305_v48 = vld [vmem:[%s5371_s27 + $0x8a0] sm:$0xf]  ;;  %v4796_v49 = vld [vmem:[%s5371_s27 + $0x8ac] sm:$0xf0]  ;;  %v4566_v1 = vld [vmem:[%s5371_s27 + $0x184] sm:$0xf]  ;;  %v3270_v8 = vor.u32 %v4534_v62, %v3267_v0 }
  0x8d   : > { %2269 = vmatpush.bf16.msra.mxu0 %v4338_v28  ;;  %v4306_v57 = vor.u32 %v4796_v49, %v4305_v48  ;;  %v4289_v60 = vld [vmem:[%s5371_s27 + $0x880] sm:$0xf]  ;;  %v4792_v61 = vld [vmem:[%s5371_s27 + $0x88c] sm:$0xf0]  ;;  %v3395_v2 = vld [vmem:[%s5371_s27 + $0x190] sm:$0xf0] }
  0x8e   : > { %2251 = vmatmul.bf16.vlgmr.msrb.gmra.mxu2 %v5555_v39  ;;  %2225 = vmatmul.bf16.vlgmr.msrb.gmra.mxu0 %v5559_v42  ;;  %v4598_v3 = vld [vmem:[%s5371_s27 + $0x284] sm:$0xf]  ;;  %v4290_v6 = vor.u32 %v4792_v61, %v4289_v60  ;;  %v3398_v9 = vor.u32 %v4566_v1, %v3395_v2  ;;  %v4273_v10 = vld [vmem:[%s5371_s27 + $0x860] sm:$0xf]  ;;  %v4788_v11 = vld [vmem:[%s5371_s27 + $0x86c] sm:$0xf0] }
  0x8f   : > { %2282 = vmatpush.bf16.msra.mxu1 %v3318_v30  ;;  %2295 = vmatpush.bf16.msra.mxu2 %v3446_v31  ;;  %v4530_v12 = vld [vmem:[%s5371_s27 + $0x64] sm:$0xf]  ;;  %v3526_v13 = vor.u32 %v4598_v3, %v3523_v4  ;;  %v3251_v14 = vld [vmem:[%s5371_s27 + $0x70] sm:$0xf0]  ;;  %v4274_v19 = vor.u32 %v4788_v11, %v4273_v10  ;;  %v4257_v24 = vld [vmem:[%s5371_s27 + $0x840] sm:$0xf] }
  0x90   : > { %2308 = vmatpush.bf16.msra.mxu3 %v3574_v35  ;;  %2238 = vmatmul.bf16.vlgmr.msrb.gmra.mxu1 %v5563_v45  ;;  %v4562_v15 = vld [vmem:[%s5371_s27 + $0x164] sm:$0xf]  ;;  %v3379_v16 = vld [vmem:[%s5371_s27 + $0x170] sm:$0xf0]  ;;  %v3254_v20 = vor.u32 %v4530_v12, %v3251_v14  ;;  %v4784_v25 = vld [vmem:[%s5371_s27 + $0x84c] sm:$0xf0] }
  0x91   : > { %2264 = vmatmul.bf16.vlgmr.msrb.gmra.mxu3 %v5561_v43  ;;  %2270 = vmatpush.bf16.msra.mxu0 %v4322_v44  ;;  %v4594_v17 = vld [vmem:[%s5371_s27 + $0x264] sm:$0xf]  ;;  %v3507_v18 = vld [vmem:[%s5371_s27 + $0x270] sm:$0xf0]  ;;  %v3382_v23 = vor.u32 %v4562_v15, %v3379_v16  ;;  %v4258_v33 = vor.u32 %v4784_v25, %v4257_v24  ;;  %v4241_v36 = vld [vmem:[%s5371_s27 + $0x820] sm:$0xf] }
  0x92   : > { %v4526_v26 = vld [vmem:[%s5371_s27 + $0x44] sm:$0xf]  ;;  %v3510_v27 = vor.u32 %v4594_v17, %v3507_v18  ;;  %v3235_v28 = vld [vmem:[%s5371_s27 + $0x50] sm:$0xf0]  ;;  %v4780_v37 = vld [vmem:[%s5371_s27 + $0x82c] sm:$0xf0] }
  0x93   : > { %2283 = vmatpush.bf16.msra.mxu1 %v3302_v46  ;;  %2296 = vmatpush.bf16.msra.mxu2 %v3430_v47  ;;  %v4558_v29 = vld [vmem:[%s5371_s27 + $0x144] sm:$0xf]  ;;  %v3363_v30 = vld [vmem:[%s5371_s27 + $0x150] sm:$0xf0]  ;;  %v3238_v34 = vor.u32 %v4526_v26, %v3235_v28  ;;  %v4242_v49 = vor.u32 %v4780_v37, %v4241_v36  ;;  %v4225_v50 = vld [vmem:[%s5371_s27 + $0x800] sm:$0xf] }
  0x94   : > { %2309 = vmatpush.bf16.msra.mxu3 %v3558_v51  ;;  %v4590_v31 = vld [vmem:[%s5371_s27 + $0x244] sm:$0xf]  ;;  %v3491_v32 = vld [vmem:[%s5371_s27 + $0x250] sm:$0xf0]  ;;  %v3366_v35 = vor.u32 %v4558_v29, %v3363_v30  ;;  %v4776_v51 = vld [vmem:[%s5371_s27 + $0x80c] sm:$0xf0] }
  0x95   : > { %2271 = vmatpush.bf16.msra.mxu0 %v4306_v57  ;;  %v4522_v38 = vld [vmem:[%s5371_s27 + $0x24] sm:$0xf]  ;;  %v3494_v40 = vor.u32 %v4590_v31, %v3491_v32  ;;  %v3219_v41 = vld [vmem:[%s5371_s27 + $0x30] sm:$0xf0]  ;;  %v404_v57 = vld [vmem:[%s5393_s14 + $0x20] sm:$0xf]  ;;  %v4226_v1 = vor.u32 %v4776_v51, %v4225_v50 }
  0x96   : > { %v4554_v44 = vld [vmem:[%s5371_s27 + $0x124] sm:$0xf]  ;;  %v3347_v46 = vld [vmem:[%s5371_s27 + $0x130] sm:$0xf0]  ;;  %v3222_v53 = vor.u32 %v4522_v38, %v3219_v41 }
  0x97   : > { %2284 = vmatpush.bf16.msra.mxu1 %v3286_v58  ;;  %2297 = vmatpush.bf16.msra.mxu2 %v3414_v59  ;;  %v4586_v47 = vld [vmem:[%s5371_s27 + $0x224] sm:$0xf]  ;;  %v3475_v48 = vld [vmem:[%s5371_s27 + $0x230] sm:$0xf0]  ;;  %v3350_v54 = vor.u32 %v4554_v44, %v3347_v46 }
  0x98   : > { %2310 = vmatpush.bf16.msra.mxu3 %v3542_v63  ;;  %v4518_v52 = vld [vmem:[%s5371_s27 + $0x4] sm:$0xf]  ;;  %v3203_v55 = vld [vmem:[%s5371_s27 + $0x10] sm:$0xf0]  ;;  %v3478_v58 = vor.u32 %v4586_v47, %v3475_v48 }
  0x99   : > { %2272 = vmatpush.bf16.msra.mxu0 %v4290_v6  ;;  %v4550_v56 = vld [vmem:[%s5371_s27 + $0x104] sm:$0xf]  ;;  %v3331_v59 = vld [vmem:[%s5371_s27 + $0x110] sm:$0xf0]  ;;  %v706_v6 = vunpack.c.l.b16 %v404_v57 }
  0x9a   : > { %v4582_v60 = vld [vmem:[%s5371_s27 + $0x204] sm:$0xf]  ;;  %v3459_v61 = vld [vmem:[%s5371_s27 + $0x210] sm:$0xf0] }
  0x9b   : > { %2285 = vmatpush.bf16.msra.mxu1 %v3270_v8  ;;  %2298 = vmatpush.bf16.msra.mxu2 %v3398_v9  ;;  %v4642_v62 = vld [vmem:[%s5371_s27 + $0x3e4] sm:$0xf]  ;;  %v3699_v63 = vld [vmem:[%s5371_s27 + $0x3f0] sm:$0xf0]  ;;  %v3206_v8 = vor.u32 %v4518_v52, %v3203_v55  ;;  %v3334_v9 = vor.u32 %v4550_v56, %v3331_v59  ;;  %v3462_v12 = vor.u32 %v4582_v60, %v3459_v61 }
  0x9c   : > { %2311 = vmatpush.bf16.msra.mxu3 %v3526_v13  ;;  %v4674_v0 = vld [vmem:[%s5371_s27 + $0x4e4] sm:$0xf]  ;;  %v3827_v2 = vld [vmem:[%s5371_s27 + $0x4f0] sm:$0xf0]  ;;  %v3702_v13 = vor.u32 %v4642_v62, %v3699_v63 }
  0x9d   : > { %2273 = vmatpush.bf16.msra.mxu0 %v4274_v19  ;;  %v4706_v3 = vld [vmem:[%s5371_s27 + $0x5e4] sm:$0xf]  ;;  %v3955_v4 = vld [vmem:[%s5371_s27 + $0x5f0] sm:$0xf0]  ;;  %v3830_v14 = vor.u32 %v4674_v0, %v3827_v2 }
  0x9e   : > { %v4738_v10 = vld [vmem:[%s5371_s27 + $0x6e4] sm:$0xf]  ;;  %v4083_v11 = vld [vmem:[%s5371_s27 + $0x6f0] sm:$0xf0]  ;;  %v3958_v15 = vor.u32 %v4706_v3, %v3955_v4 }
  0x9f   : > { %2286 = vmatpush.bf16.msra.mxu1 %v3254_v20  ;;  %2299 = vmatpush.bf16.msra.mxu2 %v3382_v23  ;;  %v4638_v16 = vld [vmem:[%s5371_s27 + $0x3c4] sm:$0xf]  ;;  %v3683_v17 = vld [vmem:[%s5371_s27 + $0x3d0] sm:$0xf0]  ;;  %v4086_v19 = vor.u32 %v4738_v10, %v4083_v11  ;;  %v5629_v20 = vpack.c.b16 %v706_v6, %v706_v6 }
  0xa0   : > { %2312 = vmatpush.bf16.msra.mxu3 %v3510_v27  ;;  %v4670_v18 = vld [vmem:[%s5371_s27 + $0x4c4] sm:$0xf]  ;;  %v3811_v23 = vld [vmem:[%s5371_s27 + $0x4d0] sm:$0xf0]  ;;  %v3686_v28 = vor.u32 %v4638_v16, %v3683_v17 }
  0xa1   : > { %2274 = vmatpush.bf16.msra.mxu0 %v4258_v33  ;;  %v4702_v24 = vld [vmem:[%s5371_s27 + $0x5c4] sm:$0xf]  ;;  %v3939_v25 = vld [vmem:[%s5371_s27 + $0x5d0] sm:$0xf0]  ;;  %v3814_v29 = vor.u32 %v4670_v18, %v3811_v23 }
  0xa2   : > { %v4734_v26 = vld [vmem:[%s5371_s27 + $0x6c4] sm:$0xf]  ;;  %v4067_v27 = vld [vmem:[%s5371_s27 + $0x6d0] sm:$0xf0]  ;;  %v3942_v30 = vor.u32 %v4702_v24, %v3939_v25 }
  0xa3   : > { %2287 = vmatpush.bf16.msra.mxu1 %v3238_v34  ;;  %2300 = vmatpush.bf16.msra.mxu2 %v3366_v35  ;;  %v4634_v31 = vld [vmem:[%s5371_s27 + $0x3a4] sm:$0xf]  ;;  %v3667_v32 = vld [vmem:[%s5371_s27 + $0x3b0] sm:$0xf0]  ;;  %v4070_v34 = vor.u32 %v4734_v26, %v4067_v27 }
  0xa4   : > { %2313 = vmatpush.bf16.msra.mxu3 %v3494_v40  ;;  %v4666_v33 = vld [vmem:[%s5371_s27 + $0x4a4] sm:$0xf]  ;;  %v3795_v35 = vld [vmem:[%s5371_s27 + $0x4b0] sm:$0xf0]  ;;  %v3670_v41 = vor.u32 %v4634_v31, %v3667_v32 }
  0xa5   : > { %2275 = vmatpush.bf16.msra.mxu0 %v4242_v49  ;;  %v4698_v36 = vld [vmem:[%s5371_s27 + $0x5a4] sm:$0xf]  ;;  %v3923_v37 = vld [vmem:[%s5371_s27 + $0x5b0] sm:$0xf0]  ;;  %v3798_v44 = vor.u32 %v4666_v33, %v3795_v35 }
  0xa6   : > { %v4730_v38 = vld [vmem:[%s5371_s27 + $0x6a4] sm:$0xf]  ;;  %v4051_v40 = vld [vmem:[%s5371_s27 + $0x6b0] sm:$0xf0]  ;;  %v3926_v46 = vor.u32 %v4698_v36, %v3923_v37 }
  0xa7   : > { %2288 = vmatpush.bf16.msra.mxu1 %v3222_v53  ;;  %2301 = vmatpush.bf16.msra.mxu2 %v3350_v54  ;;  %v4630_v47 = vld [vmem:[%s5371_s27 + $0x384] sm:$0xf]  ;;  %v3651_v48 = vld [vmem:[%s5371_s27 + $0x390] sm:$0xf0]  ;;  %v4054_v50 = vor.u32 %v4730_v38, %v4051_v40 }
  0xa8   : > { %2314 = vmatpush.bf16.msra.mxu3 %v3478_v58  ;;  %v4662_v49 = vld [vmem:[%s5371_s27 + $0x484] sm:$0xf]  ;;  %v3779_v51 = vld [vmem:[%s5371_s27 + $0x490] sm:$0xf0]  ;;  %v3654_v56 = vor.u32 %v4630_v47, %v3651_v48 }
  0xa9   : > { %2276 = vmatpush.bf16.msra.mxu0 %v4226_v1  ;;  %v4694_v52 = vld [vmem:[%s5371_s27 + $0x584] sm:$0xf]  ;;  %v3907_v53 = vld [vmem:[%s5371_s27 + $0x590] sm:$0xf0]  ;;  %v3782_v57 = vor.u32 %v4662_v49, %v3779_v51 }
  0xaa   : > { %v4726_v54 = vld [vmem:[%s5371_s27 + $0x684] sm:$0xf]  ;;  %v4035_v55 = vld [vmem:[%s5371_s27 + $0x690] sm:$0xf0]  ;;  %v3910_v58 = vor.u32 %v4694_v52, %v3907_v53 }
  0xab   : > { %2289 = vmatpush.bf16.msra.mxu1 %v3206_v8  ;;  %2302 = vmatpush.bf16.msra.mxu2 %v3334_v9  ;;  %v4626_v59 = vld [vmem:[%s5371_s27 + $0x364] sm:$0xf]  ;;  %v3635_v60 = vld [vmem:[%s5371_s27 + $0x370] sm:$0xf0]  ;;  %v4038_v62 = vor.u32 %v4726_v54, %v4035_v55  ;;  %v3321_v54 = vld [vmem:[%s5371_s27 + $0xe8] sm:$0xf] }
  0xac   : > { %2315 = vmatpush.bf16.msra.mxu3 %v3462_v12  ;;  %2277 = vmatmul.bf16.vlgmr.msra.gmra.mxu0 %v5629_v20  ;;  %v4658_v61 = vld [vmem:[%s5371_s27 + $0x464] sm:$0xf]  ;;  %v3763_v63 = vld [vmem:[%s5371_s27 + $0x470] sm:$0xf0]  ;;  %v3638_v4 = vor.u32 %v4626_v59, %v3635_v60  ;;  %v4549_v55 = vld [vmem:[%s5371_s27 + $0xf4] sm:$0xf0] }
  0xad   : > { %2321 = vmatpush.bf16.msrb.mxu0 %v3702_v13  ;;  %v4690_v0 = vld [vmem:[%s5371_s27 + $0x564] sm:$0xf]  ;;  %v3891_v1 = vld [vmem:[%s5371_s27 + $0x570] sm:$0xf0]  ;;  %v3766_v6 = vor.u32 %v4658_v61, %v3763_v63  ;;  %v4581_v59 = vld [vmem:[%s5371_s27 + $0x1f4] sm:$0xf0]  ;;  %v3322_v63 = vor.u32 %v4549_v55, %v3321_v54 }
  0xae   : > { %2303 = vmatmul.bf16.vlgmr.msra.gmra.mxu2 %v5503_v22  ;;  %2290 = vmatmul.bf16.vlgmr.msra.gmra.mxu1 %v5500_v21  ;;  %v4722_v2 = vld [vmem:[%s5371_s27 + $0x664] sm:$0xf]  ;;  %v4019_v3 = vld [vmem:[%s5371_s27 + $0x670] sm:$0xf0]  ;;  %v3894_v8 = vor.u32 %v4690_v0, %v3891_v1 }
  0xaf   : > { %2334 = vmatpush.bf16.msrb.mxu1 %v3830_v14  ;;  %2347 = vmatpush.bf16.msrb.mxu2 %v3958_v15  ;;  %v4622_v9 = vld [vmem:[%s5371_s27 + $0x344] sm:$0xf]  ;;  %v3619_v10 = vld [vmem:[%s5371_s27 + $0x350] sm:$0xf0]  ;;  %v4022_v12 = vor.u32 %v4722_v2, %v4019_v3 }
  0xb0   : > { %2360 = vmatpush.bf16.msrb.mxu3 %v4086_v19  ;;  %v4654_v11 = vld [vmem:[%s5371_s27 + $0x444] sm:$0xf]  ;;  %v3747_v13 = vld [vmem:[%s5371_s27 + $0x450] sm:$0xf0]  ;;  %v3622_v18 = vor.u32 %v4622_v9, %v3619_v10  ;;  %v3433_v9 = vld [vmem:[%s5371_s27 + $0x1c8] sm:$0xf] }
  0xb1   : > { %2316 = vmatmul.bf16.vlgmr.msra.gmra.mxu3 %v5486_v5  ;;  %2322 = vmatpush.bf16.msrb.mxu0 %v3686_v28  ;;  %v4686_v14 = vld [vmem:[%s5371_s27 + $0x544] sm:$0xf]  ;;  %v3875_v15 = vld [vmem:[%s5371_s27 + $0x550] sm:$0xf0]  ;;  %v3750_v19 = vor.u32 %v4654_v11, %v3747_v13  ;;  %v4577_v10 = vld [vmem:[%s5371_s27 + $0x1d4] sm:$0xf0] }
  0xb2   : > { %v4718_v16 = vld [vmem:[%s5371_s27 + $0x644] sm:$0xf]  ;;  %v4003_v17 = vld [vmem:[%s5371_s27 + $0x650] sm:$0xf0]  ;;  %v3878_v23 = vor.u32 %v4686_v14, %v3875_v15 }
  0xb3   : > { %2335 = vmatpush.bf16.msrb.mxu1 %v3814_v29  ;;  %2348 = vmatpush.bf16.msrb.mxu2 %v3942_v30  ;;  %v4618_v24 = vld [vmem:[%s5371_s27 + $0x324] sm:$0xf]  ;;  %v3603_v25 = vld [vmem:[%s5371_s27 + $0x330] sm:$0xf0]  ;;  %v4006_v27 = vor.u32 %v4718_v16, %v4003_v17  ;;  %v3434_v17 = vor.u32 %v4577_v10, %v3433_v9 }
  0xb4   : > { %2361 = vmatpush.bf16.msrb.mxu3 %v4070_v34  ;;  %v4650_v26 = vld [vmem:[%s5371_s27 + $0x424] sm:$0xf]  ;;  %v3731_v28 = vld [vmem:[%s5371_s27 + $0x430] sm:$0xf0]  ;;  %v3606_v33 = vor.u32 %v4618_v24, %v3603_v25  ;;  %v3417_v24 = vld [vmem:[%s5371_s27 + $0x1a8] sm:$0xf] }
  0xb5   : > { %2323 = vmatpush.bf16.msrb.mxu0 %v3670_v41  ;;  %v4682_v29 = vld [vmem:[%s5371_s27 + $0x524] sm:$0xf]  ;;  %v3859_v30 = vld [vmem:[%s5371_s27 + $0x530] sm:$0xf0]  ;;  %v3734_v36 = vor.u32 %v4650_v26, %v3731_v28  ;;  %v4573_v25 = vld [vmem:[%s5371_s27 + $0x1b4] sm:$0xf0] }
  0xb6   : > { %v4714_v31 = vld [vmem:[%s5371_s27 + $0x624] sm:$0xf]  ;;  %v3987_v32 = vld [vmem:[%s5371_s27 + $0x630] sm:$0xf0]  ;;  %v3862_v37 = vor.u32 %v4682_v29, %v3859_v30 }
  0xb7   : > { %2336 = vmatpush.bf16.msrb.mxu1 %v3798_v44  ;;  %2349 = vmatpush.bf16.msrb.mxu2 %v3926_v46  ;;  %v4614_v34 = vld [vmem:[%s5371_s27 + $0x304] sm:$0xf]  ;;  %v3587_v35 = vld [vmem:[%s5371_s27 + $0x310] sm:$0xf0]  ;;  %v3990_v44 = vor.u32 %v4714_v31, %v3987_v32  ;;  %v3418_v32 = vor.u32 %v4573_v25, %v3417_v24 }
  0xb8   : > { %2362 = vmatpush.bf16.msrb.mxu3 %v4054_v50  ;;  %v4646_v38 = vld [vmem:[%s5371_s27 + $0x404] sm:$0xf]  ;;  %v3715_v40 = vld [vmem:[%s5371_s27 + $0x410] sm:$0xf0]  ;;  %v3590_v52 = vor.u32 %v4614_v34, %v3587_v35  ;;  %v3273_v34 = vld [vmem:[%s5371_s27 + $0x88] sm:$0xf] }
  0xb9   : > { %2324 = vmatpush.bf16.msrb.mxu0 %v3654_v56  ;;  %v4678_v41 = vld [vmem:[%s5371_s27 + $0x504] sm:$0xf]  ;;  %v3843_v46 = vld [vmem:[%s5371_s27 + $0x510] sm:$0xf0]  ;;  %v3718_v56 = vor.u32 %v4646_v38, %v3715_v40  ;;  %v4537_v35 = vld [vmem:[%s5371_s27 + $0x94] sm:$0xf0] }
  0xba   : > { %v4710_v47 = vld [vmem:[%s5371_s27 + $0x604] sm:$0xf]  ;;  %v3971_v48 = vld [vmem:[%s5371_s27 + $0x610] sm:$0xf0] }
  0xbb   : > { %2337 = vmatpush.bf16.msrb.mxu1 %v3782_v57  ;;  %2350 = vmatpush.bf16.msrb.mxu2 %v3910_v58  ;;  %v4770_v49 = vld [vmem:[%s5371_s27 + $0x7e4] sm:$0xf]  ;;  %v4211_v50 = vld [vmem:[%s5371_s27 + $0x7f0] sm:$0xf0]  ;;  %v3846_v57 = vor.u32 %v4678_v41, %v3843_v46  ;;  %v3449_v58 = vld [vmem:[%s5371_s27 + $0x1e8] sm:$0xf]  ;;  %v3974_v60 = vor.u32 %v4710_v47, %v3971_v48  ;;  %v3274_v41 = vor.u32 %v4537_v35, %v3273_v34 }
  0xbc   : > { %2363 = vmatpush.bf16.msrb.mxu3 %v4038_v62  ;;  %v4802_v51 = vld [vmem:[%s5371_s27 + $0x8e4] sm:$0xf]  ;;  %v4339_v53 = vld [vmem:[%s5371_s27 + $0x8f0] sm:$0xf0]  ;;  %v4214_v61 = vor.u32 %v4770_v49, %v4211_v50  ;;  %v3450_v3 = vor.u32 %v4581_v59, %v3449_v58  ;;  %v3257_v50 = vld [vmem:[%s5371_s27 + $0x68] sm:$0xf] }
  0xbd   : > { %2325 = vmatpush.bf16.msrb.mxu0 %v3638_v4  ;;  %v4342_v62 = vor.u32 %v4802_v51, %v4339_v53  ;;  %v4766_v0 = vld [vmem:[%s5371_s27 + $0x7c4] sm:$0xf]  ;;  %v4195_v1 = vld [vmem:[%s5371_s27 + $0x7d0] sm:$0xf0]  ;;  %v4533_v51 = vld [vmem:[%s5371_s27 + $0x74] sm:$0xf0] }
  0xbe   : > { %v4798_v2 = vld [vmem:[%s5371_s27 + $0x8c4] sm:$0xf]  ;;  %v4323_v4 = vld [vmem:[%s5371_s27 + $0x8d0] sm:$0xf0]  ;;  %v4198_v11 = vor.u32 %v4766_v0, %v4195_v1  ;;  %v4565_v53 = vld [vmem:[%s5371_s27 + $0x174] sm:$0xf0] }
  0xbf   : > { %2338 = vmatpush.bf16.msrb.mxu1 %v3766_v6  ;;  %2351 = vmatpush.bf16.msrb.mxu2 %v3894_v8  ;;  %v3305_v6 = vld [vmem:[%s5371_s27 + $0xc8] sm:$0xf]  ;;  %v4545_v8 = vld [vmem:[%s5371_s27 + $0xd4] sm:$0xf0]  ;;  %v4762_v14 = vld [vmem:[%s5371_s27 + $0x7a4] sm:$0xf] }
  0xc0   : > { %2364 = vmatpush.bf16.msrb.mxu3 %v4022_v12  ;;  %v4326_v12 = vor.u32 %v4798_v2, %v4323_v4  ;;  %v3306_v13 = vor.u32 %v4545_v8, %v3305_v6  ;;  %v4179_v15 = vld [vmem:[%s5371_s27 + $0x7b0] sm:$0xf0]  ;;  %v4794_v16 = vld [vmem:[%s5371_s27 + $0x8a4] sm:$0xf]  ;;  %v3369_v0 = vld [vmem:[%s5371_s27 + $0x148] sm:$0xf] }
  0xc1   : > { %2326 = vmatpush.bf16.msrb.mxu0 %v3622_v18  ;;  %v4307_v18 = vld [vmem:[%s5371_s27 + $0x8b0] sm:$0xf0]  ;;  %v4182_v26 = vor.u32 %v4762_v14, %v4179_v15  ;;  %v4758_v29 = vld [vmem:[%s5371_s27 + $0x784] sm:$0xf]  ;;  %v4561_v1 = vld [vmem:[%s5371_s27 + $0x154] sm:$0xf0] }
  0xc2   : > { %v4163_v30 = vld [vmem:[%s5371_s27 + $0x790] sm:$0xf0]  ;;  %v4790_v31 = vld [vmem:[%s5371_s27 + $0x884] sm:$0xf]  ;;  %v3370_v10 = vor.u32 %v4561_v1, %v3369_v0  ;;  %v3353_v14 = vld [vmem:[%s5371_s27 + $0x128] sm:$0xf] }
  0xc3   : > { %2339 = vmatpush.bf16.msrb.mxu1 %v3750_v19  ;;  %2352 = vmatpush.bf16.msrb.mxu2 %v3878_v23  ;;  %v3289_v19 = vld [vmem:[%s5371_s27 + $0xa8] sm:$0xf]  ;;  %v4541_v23 = vld [vmem:[%s5371_s27 + $0xb4] sm:$0xf0]  ;;  %v4166_v38 = vor.u32 %v4758_v29, %v4163_v30  ;;  %v4147_v46 = vld [vmem:[%s5371_s27 + $0x770] sm:$0xf0] }
  0xc4   : > { %2365 = vmatpush.bf16.msrb.mxu3 %v4006_v27  ;;  %v4310_v27 = vor.u32 %v4794_v16, %v4307_v18  ;;  %v3290_v28 = vor.u32 %v4541_v23, %v3289_v19  ;;  %v4786_v47 = vld [vmem:[%s5371_s27 + $0x864] sm:$0xf]  ;;  %v4275_v49 = vld [vmem:[%s5371_s27 + $0x870] sm:$0xf0]  ;;  %v4557_v15 = vld [vmem:[%s5371_s27 + $0x134] sm:$0xf0] }
  0xc5   : > { %2327 = vmatpush.bf16.msrb.mxu0 %v3606_v33  ;;  %v4291_v33 = vld [vmem:[%s5371_s27 + $0x890] sm:$0xf0]  ;;  %v4278_v55 = vor.u32 %v4786_v47, %v4275_v49  ;;  %v4782_v59 = vld [vmem:[%s5371_s27 + $0x844] sm:$0xf]  ;;  %v3337_v29 = vld [vmem:[%s5371_s27 + $0x108] sm:$0xf] }
  0xc6   : > { %v4294_v40 = vor.u32 %v4790_v31, %v4291_v33  ;;  %v4131_v58 = vld [vmem:[%s5371_s27 + $0x750] sm:$0xf0]  ;;  %v4746_v6 = vld [vmem:[%s5371_s27 + $0x724] sm:$0xf]  ;;  %v4553_v30 = vld [vmem:[%s5371_s27 + $0x114] sm:$0xf0] }
  0xc7   : > { %2340 = vmatpush.bf16.msrb.mxu1 %v3734_v36  ;;  %2353 = vmatpush.bf16.msrb.mxu2 %v3862_v37  ;;  %v3401_v36 = vld [vmem:[%s5371_s27 + $0x188] sm:$0xf]  ;;  %v4569_v37 = vld [vmem:[%s5371_s27 + $0x194] sm:$0xf0]  ;;  %v4115_v8 = vld [vmem:[%s5371_s27 + $0x730] sm:$0xf0] }
  0xc8   : > { %2366 = vmatpush.bf16.msrb.mxu3 %v3990_v44  ;;  %v4754_v44 = vld [vmem:[%s5371_s27 + $0x764] sm:$0xf]  ;;  %v3402_v48 = vor.u32 %v4569_v37, %v3401_v36  ;;  %v4118_v16 = vor.u32 %v4746_v6, %v4115_v8  ;;  %v4099_v18 = vld [vmem:[%s5371_s27 + $0x710] sm:$0xf0]  ;;  %v3577_v31 = vld [vmem:[%s5371_s27 + $0x2e8] sm:$0xf] }
  0xc9   : > { %2328 = vmatpush.bf16.msrb.mxu0 %v3590_v52  ;;  %v3385_v52 = vld [vmem:[%s5371_s27 + $0x168] sm:$0xf]  ;;  %v4150_v54 = vor.u32 %v4754_v44, %v4147_v46  ;;  %v4778_v9 = vld [vmem:[%s5371_s27 + $0x824] sm:$0xf]  ;;  %v4227_v25 = vld [vmem:[%s5371_s27 + $0x810] sm:$0xf0]  ;;  %v3338_v46 = vor.u32 %v4553_v30, %v3337_v29 }
  0xca   : > { %v4774_v24 = vld [vmem:[%s5371_s27 + $0x804] sm:$0xf]  ;;  %v3705_v33 = vld [vmem:[%s5371_s27 + $0x3e8] sm:$0xf]  ;;  %v4645_v35 = vld [vmem:[%s5371_s27 + $0x3f4] sm:$0xf0] }
  0xcb   : > { %2341 = vmatpush.bf16.msrb.mxu1 %v3718_v56  ;;  %2354 = vmatpush.bf16.msrb.mxu2 %v3846_v57  ;;  %v3258_v56 = vor.u32 %v4533_v51, %v3257_v50  ;;  %v4750_v57 = vld [vmem:[%s5371_s27 + $0x744] sm:$0xf]  ;;  %v3833_v36 = vld [vmem:[%s5371_s27 + $0x4e8] sm:$0xf]  ;;  %v4677_v37 = vld [vmem:[%s5371_s27 + $0x4f4] sm:$0xf0] }
  0xcc   : > { %2367 = vmatpush.bf16.msrb.mxu3 %v3974_v60  ;;  %2329 = vmatmul.bf16.vlgmr.msrb.gmra.mxu0 %v5489_v7  ;;  %v3386_v60 = vor.u32 %v4565_v53, %v3385_v52  ;;  %v4134_v2 = vor.u32 %v4750_v57, %v4131_v58  ;;  %v4709_v44 = vld [vmem:[%s5371_s27 + $0x5f4] sm:$0xf0]  ;;  %v3834_v49 = vor.u32 %v4677_v37, %v3833_v36  ;;  %v3561_v50 = vld [vmem:[%s5371_s27 + $0x2c8] sm:$0xf] }
  0xcd   : > { %2373 = vmatpush.bf16.msra.mxu0 %v4214_v61  ;;  %v4259_v61 = vld [vmem:[%s5371_s27 + $0x850] sm:$0xf0]  ;;  %v4609_v51 = vld [vmem:[%s5371_s27 + $0x2d4] sm:$0xf0]  ;;  %v3689_v52 = vld [vmem:[%s5371_s27 + $0x3c8] sm:$0xf] }
  0xce   : > { %2355 = vmatmul.bf16.vlgmr.msrb.gmra.mxu2 %v5563_v45  ;;  %2342 = vmatmul.bf16.vlgmr.msrb.gmra.mxu1 %v5559_v42  ;;  %v3945_v57 = vld [vmem:[%s5371_s27 + $0x5c8] sm:$0xf]  ;;  %v4705_v58 = vld [vmem:[%s5371_s27 + $0x5d4] sm:$0xf0] }
  0xcf   : > { %2386 = vmatpush.bf16.msra.mxu1 %v4342_v62  ;;  %2399 = vmatpush.bf16.msra.mxu2 %v3322_v63  ;;  %v3241_v62 = vld [vmem:[%s5371_s27 + $0x48] sm:$0xf]  ;;  %v4529_v63 = vld [vmem:[%s5371_s27 + $0x54] sm:$0xf0]  ;;  %v3946_v1 = vor.u32 %v4705_v58, %v3945_v57 }
  0xd0   : > { %2412 = vmatpush.bf16.msra.mxu3 %v3450_v3  ;;  %v4262_v3 = vor.u32 %v4782_v59, %v4259_v61  ;;  %v3242_v4 = vor.u32 %v4529_v63, %v3241_v62  ;;  %v3562_v59 = vor.u32 %v4609_v51, %v3561_v50  ;;  %v3545_v62 = vld [vmem:[%s5371_s27 + $0x2a8] sm:$0xf]  ;;  %v4605_v63 = vld [vmem:[%s5371_s27 + $0x2b4] sm:$0xf0] }
  0xd1   : > { %2368 = vmatmul.bf16.vlgmr.msrb.gmra.mxu3 %v5555_v39  ;;  %2374 = vmatpush.bf16.msra.mxu0 %v4198_v11  ;;  %v4243_v11 = vld [vmem:[%s5371_s27 + $0x830] sm:$0xf0]  ;;  %v3673_v0 = vld [vmem:[%s5371_s27 + $0x3a8] sm:$0xf]  ;;  %v4701_v8 = vld [vmem:[%s5371_s27 + $0x5b4] sm:$0xf0] }
  0xd2   : > { %v4246_v19 = vor.u32 %v4778_v9, %v4243_v11  ;;  %v3929_v6 = vld [vmem:[%s5371_s27 + $0x5a8] sm:$0xf]  ;;  %v3546_v9 = vor.u32 %v4605_v63, %v3545_v62  ;;  %v4689_v51 = vld [vmem:[%s5371_s27 + $0x554] sm:$0xf0] }
  0xd3   : > { %2387 = vmatpush.bf16.msra.mxu1 %v4326_v12  ;;  %2400 = vmatpush.bf16.msra.mxu2 %v3306_v13  ;;  %v3225_v12 = vld [vmem:[%s5371_s27 + $0x28] sm:$0xf]  ;;  %v4525_v13 = vld [vmem:[%s5371_s27 + $0x34] sm:$0xf0] }
  0xd4   : > { %2413 = vmatpush.bf16.msra.mxu3 %v3434_v17  ;;  %v4742_v17 = vld [vmem:[%s5371_s27 + $0x704] sm:$0xf]  ;;  %v3226_v23 = vor.u32 %v4525_v13, %v3225_v12  ;;  %v3529_v12 = vld [vmem:[%s5371_s27 + $0x288] sm:$0xf]  ;;  %v4601_v13 = vld [vmem:[%s5371_s27 + $0x294] sm:$0xf0] }
  0xd5   : > { %2375 = vmatpush.bf16.msra.mxu0 %v4182_v26  ;;  %v3209_v26 = vld [vmem:[%s5371_s27 + $0x8] sm:$0xf]  ;;  %v4102_v34 = vor.u32 %v4742_v17, %v4099_v18  ;;  %v4665_v18 = vld [vmem:[%s5371_s27 + $0x494] sm:$0xf0] }
  0xd6   : > { %v3785_v17 = vld [vmem:[%s5371_s27 + $0x488] sm:$0xf]  ;;  %v4589_v58 = vld [vmem:[%s5371_s27 + $0x234] sm:$0xf0] }
  0xd7   : > { %2388 = vmatpush.bf16.msra.mxu1 %v4310_v27  ;;  %2401 = vmatpush.bf16.msra.mxu2 %v3290_v28  ;;  %v3354_v27 = vor.u32 %v4557_v15, %v3353_v14  ;;  %v4521_v28 = vld [vmem:[%s5371_s27 + $0x14] sm:$0xf0]  ;;  %v3657_v14 = vld [vmem:[%s5371_s27 + $0x388] sm:$0xf]  ;;  %v3930_v15 = vor.u32 %v4701_v8, %v3929_v6 }
  0xd8   : > { %2414 = vmatpush.bf16.msra.mxu3 %v3418_v32  ;;  %v4613_v32 = vld [vmem:[%s5371_s27 + $0x2f4] sm:$0xf0]  ;;  %v3641_v29 = vld [vmem:[%s5371_s27 + $0x368] sm:$0xf] }
  0xd9   : > { %2376 = vmatpush.bf16.msra.mxu0 %v4166_v38  ;;  %v4230_v38 = vor.u32 %v4774_v24, %v4227_v25  ;;  %v3578_v47 = vor.u32 %v4613_v32, %v3577_v31  ;;  %v3530_v24 = vor.u32 %v4601_v13, %v3529_v12  ;;  %v4629_v31 = vld [vmem:[%s5371_s27 + $0x374] sm:$0xf0]  ;;  %v3769_v32 = vld [vmem:[%s5371_s27 + $0x468] sm:$0xf] }
  0xda   : > { %v3642_v37 = vor.u32 %v4629_v31, %v3641_v29  ;;  %v3881_v50 = vld [vmem:[%s5371_s27 + $0x548] sm:$0xf]  ;;  %v4621_v62 = vld [vmem:[%s5371_s27 + $0x334] sm:$0xf0] }
  0xdb   : > { %2389 = vmatpush.bf16.msra.mxu1 %v4294_v40  ;;  %2402 = vmatpush.bf16.msra.mxu2 %v3274_v41  ;;  %v3210_v40 = vor.u32 %v4521_v28, %v3209_v26  ;;  %v3961_v41 = vld [vmem:[%s5371_s27 + $0x5e8] sm:$0xf]  ;;  %v3786_v26 = vor.u32 %v4665_v18, %v3785_v17  ;;  %v4597_v28 = vld [vmem:[%s5371_s27 + $0x274] sm:$0xf0] }
  0xdc   : > { %2415 = vmatpush.bf16.msra.mxu3 %v3402_v48  ;;  %v3706_v48 = vor.u32 %v4645_v35, %v3705_v33  ;;  %v3962_v53 = vor.u32 %v4709_v44, %v3961_v41  ;;  %v4661_v33 = vld [vmem:[%s5371_s27 + $0x474] sm:$0xf0]  ;;  %v3625_v44 = vld [vmem:[%s5371_s27 + $0x348] sm:$0xf] }
  0xdd   : > { %2377 = vmatpush.bf16.msra.mxu0 %v4150_v54  ;;  %v4641_v54 = vld [vmem:[%s5371_s27 + $0x3d4] sm:$0xf0]  ;;  %v3481_v57 = vld [vmem:[%s5371_s27 + $0x228] sm:$0xf] }
  0xde   : > { %v4693_v35 = vld [vmem:[%s5371_s27 + $0x574] sm:$0xf0]  ;;  %v3737_v63 = vld [vmem:[%s5371_s27 + $0x428] sm:$0xf] }
  0xdf   : > { %2390 = vmatpush.bf16.msra.mxu1 %v4278_v55  ;;  %2403 = vmatpush.bf16.msra.mxu2 %v3258_v56  ;;  %v3817_v55 = vld [vmem:[%s5371_s27 + $0x4c8] sm:$0xf]  ;;  %v4673_v56 = vld [vmem:[%s5371_s27 + $0x4d4] sm:$0xf0] }
  0xe0   : > { %2416 = vmatpush.bf16.msra.mxu3 %v3386_v60  ;;  %v3690_v60 = vor.u32 %v4641_v54, %v3689_v52  ;;  %v3818_v61 = vor.u32 %v4673_v56, %v3817_v55  ;;  %v4593_v41 = vld [vmem:[%s5371_s27 + $0x254] sm:$0xf0]  ;;  %v3465_v6 = vld [vmem:[%s5371_s27 + $0x208] sm:$0xf] }
  0xe1   : > { %2378 = vmatpush.bf16.msra.mxu0 %v4134_v2  ;;  %v4637_v2 = vld [vmem:[%s5371_s27 + $0x3b4] sm:$0xf0]  ;;  %v3721_v13 = vld [vmem:[%s5371_s27 + $0x408] sm:$0xf] }
  0xe2   : > { %v4585_v8 = vld [vmem:[%s5371_s27 + $0x214] sm:$0xf0]  ;;  %v4089_v18 = vld [vmem:[%s5371_s27 + $0x6e8] sm:$0xf] }
  0xe3   : > { %2391 = vmatpush.bf16.msra.mxu1 %v4262_v3  ;;  %2404 = vmatpush.bf16.msra.mxu2 %v3242_v4  ;;  %v3801_v3 = vld [vmem:[%s5371_s27 + $0x4a8] sm:$0xf]  ;;  %v4669_v4 = vld [vmem:[%s5371_s27 + $0x4b4] sm:$0xf0] }
  0xe4   : > { %2417 = vmatpush.bf16.msra.mxu3 %v3370_v10  ;;  %v3674_v10 = vor.u32 %v4637_v2, %v3673_v0  ;;  %v3802_v11 = vor.u32 %v4669_v4, %v3801_v3  ;;  %v4653_v0 = vld [vmem:[%s5371_s27 + $0x434] sm:$0xf0]  ;;  %v3865_v2 = vld [vmem:[%s5371_s27 + $0x528] sm:$0xf]  ;;  %v3482_v4 = vor.u32 %v4589_v58, %v3481_v57 }
  0xe5   : > { %2379 = vmatpush.bf16.msra.mxu0 %v4118_v16  ;;  %v4633_v16 = vld [vmem:[%s5371_s27 + $0x394] sm:$0xf0]  ;;  %v4057_v58 = vld [vmem:[%s5371_s27 + $0x6a8] sm:$0xf] }
  0xe6   : > { %v3658_v25 = vor.u32 %v4633_v16, %v3657_v14  ;;  %v4685_v3 = vld [vmem:[%s5371_s27 + $0x534] sm:$0xf0]  ;;  %v3849_v16 = vld [vmem:[%s5371_s27 + $0x508] sm:$0xf] }
  0xe7   : > { %2392 = vmatpush.bf16.msra.mxu1 %v4246_v19  ;;  %2405 = vmatpush.bf16.msra.mxu2 %v3226_v23  ;;  %v3913_v19 = vld [vmem:[%s5371_s27 + $0x588] sm:$0xf]  ;;  %v4697_v23 = vld [vmem:[%s5371_s27 + $0x594] sm:$0xf0]  ;;  %v3866_v14 = vor.u32 %v4685_v3, %v3865_v2  ;;  %v4539_v3 = vld [vmem:[%s5371_s27 + $0xac] sm:$0xf] }
  0xe8   : > { %2418 = vmatpush.bf16.msra.mxu3 %v3354_v27  ;;  %v3513_v27 = vld [vmem:[%s5371_s27 + $0x268] sm:$0xf]  ;;  %v3914_v30 = vor.u32 %v4697_v23, %v3913_v19  ;;  %v4617_v12 = vld [vmem:[%s5371_s27 + $0x314] sm:$0xf0] }
  0xe9   : > { %2380 = vmatpush.bf16.msra.mxu0 %v4102_v34  ;;  %v3897_v34 = vld [vmem:[%s5371_s27 + $0x568] sm:$0xf]  ;;  %v3514_v36 = vor.u32 %v4597_v28, %v3513_v27  ;;  %v4681_v17 = vld [vmem:[%s5371_s27 + $0x514] sm:$0xf0] }
  0xea   : > { %v4741_v19 = vld [vmem:[%s5371_s27 + $0x6f4] sm:$0xf0]  ;;  %v4217_v23 = vld [vmem:[%s5371_s27 + $0x7e8] sm:$0xf] }
  0xeb   : > { %2393 = vmatpush.bf16.msra.mxu1 %v4230_v38  ;;  %2406 = vmatpush.bf16.msra.mxu2 %v3210_v40  ;;  %v3770_v38 = vor.u32 %v4661_v33, %v3769_v32  ;;  %v3497_v40 = vld [vmem:[%s5371_s27 + $0x248] sm:$0xf]  ;;  %v4805_v28 = vld [vmem:[%s5371_s27 + $0x8f4] sm:$0xf0]  ;;  %v4547_v32 = vld [vmem:[%s5371_s27 + $0xec] sm:$0xf] }
  0xec   : > { %2419 = vmatpush.bf16.msra.mxu3 %v3338_v46  ;;  %2381 = vmatmul.bf16.vlgmr.msra.gmra.mxu0 %v5561_v43  ;;  %v3898_v46 = vor.u32 %v4693_v35, %v3897_v34  ;;  %v4345_v27 = vld [vmem:[%s5371_s27 + $0x8e8] sm:$0xf]  ;;  %v3323_v33 = vld [vmem:[%s5371_s27 + $0xf8] sm:$0xf0]  ;;  %v3850_v35 = vor.u32 %v4681_v17, %v3849_v16  ;;  %v4797_v2 = vld [vmem:[%s5371_s27 + $0x8b4] sm:$0xf0] }
  0xed   : > { %2425 = vmatpush.bf16.msrb.mxu0 %v3578_v47  ;;  %v4625_v47 = vld [vmem:[%s5371_s27 + $0x354] sm:$0xf0]  ;;  %v4535_v17 = vld [vmem:[%s5371_s27 + $0x8c] sm:$0xf] }
  0xee   : > { %2394 = vmatmul.bf16.vlgmr.msra.gmra.mxu1 %v5629_v20  ;;  %2407 = vmatmul.bf16.vlgmr.msra.gmra.mxu2 %v5500_v21  ;;  %v3626_v55 = vor.u32 %v4625_v47, %v3625_v44  ;;  %v4737_v44 = vld [vmem:[%s5371_s27 + $0x6d4] sm:$0xf0]  ;;  %v3326_v47 = vor.u32 %v4547_v32, %v3323_v33  ;;  %v4281_v32 = vld [vmem:[%s5371_s27 + $0x868] sm:$0xf] }
  0xef   : > { %2438 = vmatpush.bf16.msrb.mxu1 %v3706_v48  ;;  %2451 = vmatpush.bf16.msrb.mxu2 %v3834_v49  ;;  %v3753_v48 = vld [vmem:[%s5371_s27 + $0x448] sm:$0xf]  ;;  %v4657_v49 = vld [vmem:[%s5371_s27 + $0x454] sm:$0xf0] }
  0xf0   : > { %2464 = vmatpush.bf16.msrb.mxu3 %v3962_v53  ;;  %v3498_v53 = vor.u32 %v4593_v41, %v3497_v40  ;;  %v3754_v56 = vor.u32 %v4657_v49, %v3753_v48  ;;  %v4346_v40 = vor.u32 %v4805_v28, %v4345_v27  ;;  %v4073_v41 = vld [vmem:[%s5371_s27 + $0x6c8] sm:$0xf]  ;;  %v4769_v48 = vld [vmem:[%s5371_s27 + $0x7d4] sm:$0xf0] }
  0xf1   : > { %2426 = vmatpush.bf16.msrb.mxu0 %v3562_v59  ;;  %2420 = vmatmul.bf16.vlgmr.msra.gmra.mxu3 %v5503_v22  ;;  %v3609_v59 = vld [vmem:[%s5371_s27 + $0x328] sm:$0xf]  ;;  %v4793_v16 = vld [vmem:[%s5371_s27 + $0x894] sm:$0xf0] }
  0xf2   : > { %v4329_v49 = vld [vmem:[%s5371_s27 + $0x8c8] sm:$0xf]  ;;  %v4725_v27 = vld [vmem:[%s5371_s27 + $0x674] sm:$0xf0] }
  0xf3   : > { %2439 = vmatpush.bf16.msrb.mxu1 %v3690_v60  ;;  %2452 = vmatpush.bf16.msrb.mxu2 %v3818_v61  ;;  %v5815_v60 = vpop.f32.mrf.mxu2  ;;  %v3882_v61 = vor.u32 %v4689_v51, %v3881_v50  ;;  %v4801_v50 = vld [vmem:[%s5371_s27 + $0x8d4] sm:$0xf0]  ;;  %v4543_v51 = vld [vmem:[%s5371_s27 + $0xcc] sm:$0xf]  ;;  %v4153_v28 = vld [vmem:[%s5371_s27 + $0x768] sm:$0xf] }
  0xf4   : > { %2465 = vmatpush.bf16.msrb.mxu3 %v3946_v1  ;;  %v5820_v1 = vpop.f32.mrf.mxu3  ;;  %v4330_v57 = vor.u32 %v4801_v50, %v4329_v49  ;;  %v4789_v33 = vld [vmem:[%s5371_s27 + $0x874] sm:$0xf0] }
  0xf5   : > { %2427 = vmatpush.bf16.msrb.mxu0 %v3546_v9  ;;  %v3610_v9 = vor.u32 %v4621_v62, %v3609_v59  ;;  %v4733_v59 = vld [vmem:[%s5371_s27 + $0x6b4] sm:$0xf0] }
  0xf6   : > { %v4753_v49 = vld [vmem:[%s5371_s27 + $0x754] sm:$0xf0] }
  0xf7   : > { %2440 = vmatpush.bf16.msrb.mxu1 %v3674_v10  ;;  %2453 = vmatpush.bf16.msrb.mxu2 %v3802_v11  ;;  %v5808_v52 = vpop.f32.mrf.mxu0  ;;  %v5810_v54 = vpop.f32.mrf.mxu1  ;;  %v3738_v10 = vor.u32 %v4653_v0, %v3737_v63  ;;  %v3593_v11 = vld [vmem:[%s5371_s27 + $0x308] sm:$0xf]  ;;  %v4765_v63 = vld [vmem:[%s5371_s27 + $0x7b4] sm:$0xf0] }
  0xf8   : > { %2466 = vmatpush.bf16.msrb.mxu3 %v3930_v15  ;;  %v4649_v15 = vld [vmem:[%s5371_s27 + $0x414] sm:$0xf0]  ;;  %v4313_v0 = vld [vmem:[%s5371_s27 + $0x8a8] sm:$0xf] }
  0xf9   : > { %2428 = vmatpush.bf16.msrb.mxu0 %v3530_v24  ;;  %v3722_v31 = vor.u32 %v4649_v15, %v3721_v13  ;;  %v4297_v15 = vld [vmem:[%s5371_s27 + $0x888] sm:$0xf] }
  0xfb   : > { %2441 = vmatpush.bf16.msrb.mxu1 %v3658_v25  ;;  %2454 = vmatpush.bf16.msrb.mxu2 %v3786_v26  ;;  %v3466_v25 = vor.u32 %v4585_v8, %v3465_v6  ;;  %v4773_v26 = vld [vmem:[%s5371_s27 + $0x7f4] sm:$0xf0]  ;;  %v2202_v34 = vpop.f32.mrf.mxu2  ;;  %v4058_v6 = vor.u32 %v4733_v59, %v4057_v58 }
  0xfc   : > { %2467 = vmatpush.bf16.msrb.mxu3 %v3914_v30  ;;  %v3594_v30 = vor.u32 %v4617_v12, %v3593_v11  ;;  %v4729_v11 = vld [vmem:[%s5371_s27 + $0x694] sm:$0xf0]  ;;  %v4169_v12 = vld [vmem:[%s5371_s27 + $0x788] sm:$0xf]  ;;  %v4531_v34 = vld [vmem:[%s5371_s27 + $0x6c] sm:$0xf] }
  0xfd   : > { %2429 = vmatpush.bf16.msrb.mxu0 %v3514_v36  ;;  %v4090_v36 = vor.u32 %v4741_v19, %v4089_v18  ;;  %v3275_v18 = vld [vmem:[%s5371_s27 + $0x98] sm:$0xf0] }
  0xff   : > { %2442 = vmatpush.bf16.msrb.mxu1 %v3642_v37  ;;  %2455 = vmatpush.bf16.msrb.mxu2 %v3770_v38  ;;  %v2176_v24 = vpop.f32.mrf.mxu0  ;;  %v2189_v29 = vpop.f32.mrf.mxu1  ;;  %v4218_v38 = vor.u32 %v4773_v26, %v4217_v23  ;;  %v4025_v26 = vld [vmem:[%s5371_s27 + $0x668] sm:$0xf] }
 0x100   : > { %2468 = vmatpush.bf16.msrb.mxu3 %v3898_v46  ;;  %v2215_v37 = vpop.f32.mrf.mxu3  ;;  %v4201_v46 = vld [vmem:[%s5371_s27 + $0x7c8] sm:$0xf] }
 0x101   : > { %2430 = vmatpush.bf16.msrb.mxu0 %v3498_v53  ;;  %v3307_v53 = vld [vmem:[%s5371_s27 + $0xd8] sm:$0xf0]  ;;  %v4026_v37 = vor.u32 %v4725_v27, %v4025_v26  ;;  %v4579_v27 = vld [vmem:[%s5371_s27 + $0x1ec] sm:$0xf] }
 0x102   : > { %v3310_v62 = vor.u32 %v4543_v51, %v3307_v53  ;;  %v4527_v51 = vld [vmem:[%s5371_s27 + $0x4c] sm:$0xf]  ;;  %v3243_v53 = vld [vmem:[%s5371_s27 + $0x58] sm:$0xf0] }
 0x103   : > { %2443 = vmatpush.bf16.msrb.mxu1 %v3626_v55  ;;  %2456 = vmatpush.bf16.msrb.mxu2 %v3754_v56  ;;  %v4074_v55 = vor.u32 %v4737_v44, %v4073_v41  ;;  %v4202_v56 = vor.u32 %v4769_v48, %v4201_v46  ;;  %v4009_v41 = vld [vmem:[%s5371_s27 + $0x648] sm:$0xf]  ;;  %v4721_v44 = vld [vmem:[%s5371_s27 + $0x654] sm:$0xf0] }
 0x104   : > { %2469 = vmatpush.bf16.msrb.mxu3 %v3882_v61  ;;  %v4185_v61 = vld [vmem:[%s5371_s27 + $0x7a8] sm:$0xf] }
 0x105   : > { %2431 = vmatpush.bf16.msrb.mxu0 %v3482_v4  ;;  %v3291_v4 = vld [vmem:[%s5371_s27 + $0xb8] sm:$0xf0]  ;;  %v4186_v8 = vor.u32 %v4765_v63, %v4185_v61  ;;  %v4137_v46 = vld [vmem:[%s5371_s27 + $0x748] sm:$0xf] }
 0x106   : > { %v3294_v13 = vor.u32 %v4539_v3, %v3291_v4  ;;  %v4138_v58 = vor.u32 %v4753_v49, %v4137_v46  ;;  %v3993_v61 = vld [vmem:[%s5371_s27 + $0x628] sm:$0xf]  ;;  %v4781_v4 = vld [vmem:[%s5371_s27 + $0x834] sm:$0xf0]  ;;  %v3435_v49 = vld [vmem:[%s5371_s27 + $0x1d8] sm:$0xf0] }
 0x107   : > { %2444 = vmatpush.bf16.msrb.mxu1 %v3610_v9  ;;  %2457 = vmatpush.bf16.msrb.mxu2 %v3738_v10  ;;  %v4314_v9 = vor.u32 %v4797_v2, %v4313_v0  ;;  %v4041_v10 = vld [vmem:[%s5371_s27 + $0x688] sm:$0xf]  ;;  %v3246_v2 = vor.u32 %v4527_v51, %v3243_v53  ;;  %v3563_v53 = vld [vmem:[%s5371_s27 + $0x2d8] sm:$0xf0] }
 0x108   : > { %2470 = vmatpush.bf16.msrb.mxu3 %v3866_v14  ;;  %v4761_v14 = vld [vmem:[%s5371_s27 + $0x794] sm:$0xf0]  ;;  %v4042_v19 = vor.u32 %v4729_v11, %v4041_v10  ;;  %v4121_v63 = vld [vmem:[%s5371_s27 + $0x728] sm:$0xf] }
 0x109   : > { %2432 = vmatpush.bf16.msrb.mxu0 %v3466_v25  ;;  %v4170_v24 = vor.u32 %v4761_v14, %v4169_v12  ;;  %v4298_v25 = vor.u32 %v4793_v16, %v4297_v15  ;;  %v4249_v3 = vld [vmem:[%s5371_s27 + $0x828] sm:$0xf]  ;;  %v4713_v12 = vld [vmem:[%s5371_s27 + $0x614] sm:$0xf0] }
 0x10a   : > { %v3977_v11 = vld [vmem:[%s5371_s27 + $0x608] sm:$0xf]  ;;  %v4250_v14 = vor.u32 %v4781_v4, %v4249_v3  ;;  %v4745_v16 = vld [vmem:[%s5371_s27 + $0x714] sm:$0xf0]  ;;  %v3547_v3 = vld [vmem:[%s5371_s27 + $0x2b8] sm:$0xf0] }
 0x10b   : > { %2445 = vmatpush.bf16.msrb.mxu1 %v3594_v30  ;;  %2458 = vmatpush.bf16.msrb.mxu2 %v3722_v31  ;;  %v5868_v23 = vpop.f32.mrf.mxu0  ;;  %v3278_v30 = vor.u32 %v4535_v17, %v3275_v18  ;;  %v4757_v31 = vld [vmem:[%s5371_s27 + $0x774] sm:$0xf0]  ;;  %v4105_v15 = vld [vmem:[%s5371_s27 + $0x708] sm:$0xf]  ;;  %v4635_v4 = vld [vmem:[%s5371_s27 + $0x3ac] sm:$0xf] }
 0x10c   : > { %2471 = vmatpush.bf16.msrb.mxu3 %v3850_v35  ;;  %2433 = vmatmul.bf16.vlgmr.msrb.gmra.mxu0 %v5486_v5  ;;  %v3259_v35 = vld [vmem:[%s5371_s27 + $0x78] sm:$0xf0]  ;;  %v4233_v17 = vld [vmem:[%s5371_s27 + $0x808] sm:$0xf] }
 0x10d   : > { %2477 = vmatpush.bf16.msra.mxu0 %v4090_v36  ;;  %v5873_v29 = vpop.f32.mrf.mxu1  ;;  %v2188_v36 = vadd.f32 %v5810_v54, %v5808_v52  ;;  %v3262_v48 = vor.u32 %v4531_v34, %v3259_v35  ;;  %v4265_v52 = vld [vmem:[%s5371_s27 + $0x848] sm:$0xf]  ;;  %v4785_v54 = vld [vmem:[%s5371_s27 + $0x854] sm:$0xf0]  ;;  %v4643_v34 = vld [vmem:[%s5371_s27 + $0x3ec] sm:$0xf] }
 0x10e   : > { %2459 = vmatmul.bf16.vlgmr.msrb.gmra.mxu2 %v5559_v42  ;;  %2446 = vmatmul.bf16.vlgmr.msrb.gmra.mxu1 %v5489_v7  ;;  %v4266_v59 = vor.u32 %v4785_v54, %v4265_v52  ;;  %v3707_v35 = vld [vmem:[%s5371_s27 + $0x3f8] sm:$0xf0]  ;;  %v4607_v52 = vld [vmem:[%s5371_s27 + $0x2cc] sm:$0xf] }
 0x10f   : > { %2490 = vmatpush.bf16.msra.mxu1 %v4218_v38  ;;  %2503 = vmatpush.bf16.msra.mxu2 %v4346_v40  ;;  %v4154_v38 = vor.u32 %v4757_v31, %v4153_v28  ;;  %v4282_v40 = vor.u32 %v4789_v33, %v4281_v32  ;;  %v3451_v28 = vld [vmem:[%s5371_s27 + $0x1f8] sm:$0xf0]  ;;  %v3978_v32 = vor.u32 %v4713_v12, %v3977_v11  ;;  %v4567_v12 = vld [vmem:[%s5371_s27 + $0x18c] sm:$0xf] }
 0x110   : > { %2516 = vmatpush.bf16.msra.mxu3 %v3326_v47  ;;  %v3579_v33 = vld [vmem:[%s5371_s27 + $0x2f8] sm:$0xf0]  ;;  %v3710_v46 = vor.u32 %v4643_v34, %v3707_v35 }
 0x111   : > { %2472 = vmatmul.bf16.vlgmr.msrb.gmra.mxu3 %v5563_v45  ;;  %2478 = vmatpush.bf16.msra.mxu0 %v4074_v55  ;;  %v5885_v47 = vpop.f32.mrf.mxu2  ;;  %v2201_v55 = vadd.f32 %v5815_v60, %v2188_v36  ;;  %v4749_v60 = vld [vmem:[%s5371_s27 + $0x734] sm:$0xf0]  ;;  %v4106_v36 = vor.u32 %v4745_v16, %v4105_v15 }
 0x113   : > { %2491 = vmatpush.bf16.msra.mxu1 %v4202_v56  ;;  %2504 = vmatpush.bf16.msra.mxu2 %v4330_v57  ;;  %v4010_v56 = vor.u32 %v4721_v44, %v4009_v41  ;;  %v2228_v57 = vpop.f32.mrf.mxu0  ;;  %v3454_v41 = vor.u32 %v4579_v27, %v3451_v28 }
 0x114   : > { %2517 = vmatpush.bf16.msra.mxu3 %v3310_v62  ;;  %v5890_v50 = vpop.f32.mrf.mxu3  ;;  %v4717_v62 = vld [vmem:[%s5371_s27 + $0x634] sm:$0xf0]  ;;  %v4671_v57 = vld [vmem:[%s5371_s27 + $0x4cc] sm:$0xf] }
 0x115   : > { %2479 = vmatpush.bf16.msra.mxu0 %v4058_v6  ;;  %v2241_v0 = vpop.f32.mrf.mxu1  ;;  %v4523_v6 = vld [vmem:[%s5371_s27 + $0x2c] sm:$0xf]  ;;  %v3994_v10 = vor.u32 %v4717_v62, %v3993_v61 }
 0x116   : > { %v4571_v62 = vld [vmem:[%s5371_s27 + $0x1ac] sm:$0xf] }
 0x117   : > { %2492 = vmatpush.bf16.msra.mxu1 %v4186_v8  ;;  %2505 = vmatpush.bf16.msra.mxu2 %v4314_v9  ;;  %v3227_v8 = vld [vmem:[%s5371_s27 + $0x38] sm:$0xf0]  ;;  %v2214_v9 = vadd.f32 %v5820_v1, %v2201_v55  ;;  %v4639_v55 = vld [vmem:[%s5371_s27 + $0x3cc] sm:$0xf] }
 0x118   : > { %2518 = vmatpush.bf16.msra.mxu3 %v3294_v13  ;;  %v4122_v13 = vor.u32 %v4749_v60, %v4121_v63  ;;  %v3230_v18 = vor.u32 %v4523_v6, %v3227_v8  ;;  %v3419_v63 = vld [vmem:[%s5371_s27 + $0x1b8] sm:$0xf0]  ;;  %v4603_v0 = vld [vmem:[%s5371_s27 + $0x2ac] sm:$0xf] }
 0x119   : > { %2480 = vmatpush.bf16.msra.mxu0 %v4042_v19  ;;  %v2254_v1 = vpop.f32.mrf.mxu2  ;;  %v4777_v19 = vld [vmem:[%s5371_s27 + $0x814] sm:$0xf0]  ;;  %v2227_v31 = vadd.f32 %v5868_v23, %v2214_v9  ;;  %v3675_v6 = vld [vmem:[%s5371_s27 + $0x3b8] sm:$0xf0]  ;;  %v4667_v8 = vld [vmem:[%s5371_s27 + $0x4ac] sm:$0xf] }
 0x11a   : > { %v3803_v9 = vld [vmem:[%s5371_s27 + $0x4b8] sm:$0xf0]  ;;  %v3678_v11 = vor.u32 %v4635_v4, %v3675_v6  ;;  %v4631_v1 = vld [vmem:[%s5371_s27 + $0x38c] sm:$0xf] }
 0x11b   : > { %2493 = vmatpush.bf16.msra.mxu1 %v4170_v24  ;;  %2506 = vmatpush.bf16.msra.mxu2 %v4298_v25  ;;  %v4519_v24 = vld [vmem:[%s5371_s27 + $0xc] sm:$0xf]  ;;  %v3211_v25 = vld [vmem:[%s5371_s27 + $0x18] sm:$0xf0]  ;;  %v2240_v54 = vadd.f32 %v5873_v29, %v2227_v31  ;;  %v3566_v29 = vor.u32 %v4607_v52, %v3563_v53  ;;  %v3806_v16 = vor.u32 %v4667_v8, %v3803_v9 }
 0x11c   : > { %2519 = vmatpush.bf16.msra.mxu3 %v3278_v30  ;;  %v2267_v26 = vpop.f32.mrf.mxu3  ;;  %v4611_v30 = vld [vmem:[%s5371_s27 + $0x2ec] sm:$0xf]  ;;  %v3214_v23 = vor.u32 %v4519_v24, %v3211_v25  ;;  %v3787_v25 = vld [vmem:[%s5371_s27 + $0x498] sm:$0xf0] }
 0x11d   : > { %2481 = vmatpush.bf16.msra.mxu0 %v4026_v37  ;;  %v4234_v37 = vor.u32 %v4777_v19, %v4233_v17  ;;  %v3582_v44 = vor.u32 %v4611_v30, %v3579_v33  ;;  %v3531_v17 = vld [vmem:[%s5371_s27 + $0x298] sm:$0xf0]  ;;  %v4663_v24 = vld [vmem:[%s5371_s27 + $0x48c] sm:$0xf] }
 0x11e   : > { %v4563_v30 = vld [vmem:[%s5371_s27 + $0x16c] sm:$0xf]  ;;  %v3387_v31 = vld [vmem:[%s5371_s27 + $0x178] sm:$0xf0]  ;;  %v3790_v35 = vor.u32 %v4663_v24, %v3787_v25 }
 0x11f   : > { %2494 = vmatpush.bf16.msra.mxu1 %v4154_v38  ;;  %2507 = vmatpush.bf16.msra.mxu2 %v4282_v40  ;;  %v4675_v38 = vld [vmem:[%s5371_s27 + $0x4ec] sm:$0xf]  ;;  %v3835_v40 = vld [vmem:[%s5371_s27 + $0x4f8] sm:$0xf0] }
 0x120   : > { %2520 = vmatpush.bf16.msra.mxu3 %v3262_v48  ;;  %v4575_v48 = vld [vmem:[%s5371_s27 + $0x1cc] sm:$0xf]  ;;  %v3838_v51 = vor.u32 %v4675_v38, %v3835_v40  ;;  %v3643_v38 = vld [vmem:[%s5371_s27 + $0x378] sm:$0xf0] }
 0x121   : > { %2482 = vmatpush.bf16.msra.mxu0 %v4010_v56  ;;  %v3691_v56 = vld [vmem:[%s5371_s27 + $0x3d8] sm:$0xf0]  ;;  %v4659_v40 = vld [vmem:[%s5371_s27 + $0x46c] sm:$0xf] }
 0x122   : > { %v3694_v61 = vor.u32 %v4639_v55, %v3691_v56  ;;  %v4591_v52 = vld [vmem:[%s5371_s27 + $0x24c] sm:$0xf]  ;;  %v3627_v55 = vld [vmem:[%s5371_s27 + $0x358] sm:$0xf0] }
 0x123   : > { %2495 = vmatpush.bf16.msra.mxu1 %v4138_v58  ;;  %2508 = vmatpush.bf16.msra.mxu2 %v4266_v59  ;;  %v3819_v58 = vld [vmem:[%s5371_s27 + $0x4d8] sm:$0xf0]  ;;  %v3438_v59 = vor.u32 %v4575_v48, %v3435_v49  ;;  %v4559_v48 = vld [vmem:[%s5371_s27 + $0x14c] sm:$0xf] }
 0x124   : > { %2521 = vmatpush.bf16.msra.mxu3 %v3246_v2  ;;  %v2253_v2 = vadd.f32 %v5885_v47, %v2240_v54  ;;  %v3822_v60 = vor.u32 %v4671_v57, %v3819_v58  ;;  %v3422_v47 = vor.u32 %v4571_v62, %v3419_v63  ;;  %v3371_v49 = vld [vmem:[%s5371_s27 + $0x158] sm:$0xf0]  ;;  %v4623_v53 = vld [vmem:[%s5371_s27 + $0x34c] sm:$0xf] }
 0x125   : > { %2483 = vmatpush.bf16.msra.mxu0 %v3994_v10  ;;  %v3550_v10 = vor.u32 %v4603_v0, %v3547_v3  ;;  %v4655_v58 = vld [vmem:[%s5371_s27 + $0x44c] sm:$0xf]  ;;  %v3630_v63 = vor.u32 %v4623_v53, %v3627_v55  ;;  %v3483_v6 = vld [vmem:[%s5371_s27 + $0x238] sm:$0xf0] }
 0x126   : > { %v2266_v15 = vadd.f32 %v5890_v50, %v2253_v2  ;;  %v4555_v0 = vld [vmem:[%s5371_s27 + $0x12c] sm:$0xf]  ;;  %v3355_v2 = vld [vmem:[%s5371_s27 + $0x138] sm:$0xf0] }
 0x127   : > { %2496 = vmatpush.bf16.msra.mxu1 %v4122_v13  ;;  %2509 = vmatpush.bf16.msra.mxu2 %v4250_v14  ;;  %v3403_v13 = vld [vmem:[%s5371_s27 + $0x198] sm:$0xf0]  ;;  %v4599_v14 = vld [vmem:[%s5371_s27 + $0x28c] sm:$0xf] }
 0x128   : > { %2522 = vmatpush.bf16.msra.mxu3 %v3230_v18  ;;  %v3659_v18 = vld [vmem:[%s5371_s27 + $0x398] sm:$0xf0]  ;;  %v3406_v27 = vor.u32 %v4567_v12, %v3403_v13  ;;  %v3534_v50 = vor.u32 %v4599_v14, %v3531_v17  ;;  %v4619_v8 = vld [vmem:[%s5371_s27 + $0x32c] sm:$0xf] }
 0x129   : > { %2484 = vmatpush.bf16.msra.mxu0 %v3978_v32  ;;  %v2278_v19 = vpop.f32.mrf.mxu0  ;;  %v3662_v28 = vor.u32 %v4631_v1, %v3659_v18  ;;  %v4595_v32 = vld [vmem:[%s5371_s27 + $0x26c] sm:$0xf]  ;;  %v3611_v9 = vld [vmem:[%s5371_s27 + $0x338] sm:$0xf0] }
 0x12a   : > { %v2279_v26 = vadd.f32 %v2278_v19, %v2266_v15  ;;  %v4551_v12 = vld [vmem:[%s5371_s27 + $0x10c] sm:$0xf]  ;;  %v3339_v13 = vld [vmem:[%s5371_s27 + $0x118] sm:$0xf0]  ;;  %v3614_v15 = vor.u32 %v4619_v8, %v3611_v9 }
 0x12b   : > { %2497 = vmatpush.bf16.msra.mxu1 %v4106_v36  ;;  %2510 = vmatpush.bf16.msra.mxu2 %v4234_v37  ;;  %v5955_v33 = vpop.f32.mrf.mxu1  ;;  %v3515_v36 = vld [vmem:[%s5371_s27 + $0x278] sm:$0xf0]  ;;  %v4627_v37 = vld [vmem:[%s5371_s27 + $0x36c] sm:$0xf] }
 0x12c   : > { %2523 = vmatpush.bf16.msra.mxu3 %v3214_v23  ;;  %2485 = vmatmul.bf16.vlgmr.msra.gmra.mxu0 %v5555_v39  ;;  %v3771_v23 = vld [vmem:[%s5371_s27 + $0x478] sm:$0xf0]  ;;  %v4615_v1 = vld [vmem:[%s5371_s27 + $0x30c] sm:$0xf] }
 0x12d   : > { %2529 = vmatpush.bf16.msrb.mxu0 %v3454_v41  ;;  %v3390_v41 = vor.u32 %v4563_v30, %v3387_v31  ;;  %v3774_v54 = vor.u32 %v4659_v40, %v3771_v23  ;;  %v3467_v17 = vld [vmem:[%s5371_s27 + $0x218] sm:$0xf0]  ;;  %v4647_v19 = vld [vmem:[%s5371_s27 + $0x40c] sm:$0xf]  ;;  %v3342_v30 = vor.u32 %v4551_v12, %v3339_v13 }
 0x12e   : > { %2511 = vmatmul.bf16.vlgmr.msra.gmra.mxu2 %v5629_v20  ;;  %2498 = vmatmul.bf16.vlgmr.msra.gmra.mxu1 %v5561_v43  ;;  %v3723_v24 = vld [vmem:[%s5371_s27 + $0x418] sm:$0xf0]  ;;  %v4799_v55 = vld [vmem:[%s5371_s27 + $0x8cc] sm:$0xf] }
 0x12f   : > { %2542 = vmatpush.bf16.msrb.mxu1 %v3582_v44  ;;  %2555 = vmatpush.bf16.msrb.mxu2 %v3710_v46  ;;  %v3518_v44 = vor.u32 %v4595_v32, %v3515_v36  ;;  %v3646_v46 = vor.u32 %v4627_v37, %v3643_v38  ;;  %v4091_v31 = vld [vmem:[%s5371_s27 + $0x6f8] sm:$0xf0]  ;;  %v4771_v32 = vld [vmem:[%s5371_s27 + $0x7ec] sm:$0xf]  ;;  %v3726_v40 = vor.u32 %v4647_v19, %v3723_v24 }
 0x130   : > { %2568 = vmatpush.bf16.msrb.mxu3 %v3838_v51  ;;  %v3499_v51 = vld [vmem:[%s5371_s27 + $0x258] sm:$0xf0]  ;;  %v4803_v37 = vld [vmem:[%s5371_s27 + $0x8ec] sm:$0xf] }
 0x131   : > { %2530 = vmatpush.bf16.msrb.mxu0 %v3438_v59  ;;  %2524 = vmatmul.bf16.vlgmr.msra.gmra.mxu3 %v5500_v21  ;;  %v396_v21 = vld [vmem:[#allocation2 + $0x10] sm:$0xff]  ;;  %v5968_v56 = vpop.f32.mrf.mxu2  ;;  %v3755_v59 = vld [vmem:[%s5371_s27 + $0x458] sm:$0xf0]  ;;  %v3502_v62 = vor.u32 %v4591_v52, %v3499_v51  ;;  %v4767_v51 = vld [vmem:[%s5371_s27 + $0x7cc] sm:$0xf] }
 0x132   : > { %v2633_v34 = vadd.f32 %v2279_v26, %v396_v21  ;;  %v3758_v4 = vor.u32 %v4655_v58, %v3755_v59  ;;  %v3595_v21 = vld [vmem:[%s5371_s27 + $0x318] sm:$0xf0]  ;;  %v4759_v13 = vld [vmem:[%s5371_s27 + $0x78c] sm:$0xf] }
 0x133   : > { %2543 = vmatpush.bf16.msrb.mxu1 %v3566_v29  ;;  %2556 = vmatpush.bf16.msrb.mxu2 %v3694_v61  ;;  %v2280_v29 = vpop.f32.mrf.mxu0  ;;  %v3374_v61 = vor.u32 %v4559_v48, %v3371_v49  ;;  %v2293_v3 = vpop.f32.mrf.mxu1  ;;  %v3598_v36 = vor.u32 %v4615_v1, %v3595_v21  ;;  %v4347_v38 = vld [vmem:[%s5371_s27 + $0x8f8] sm:$0xf0]  ;;  %v4735_v49 = vld [vmem:[%s5371_s27 + $0x6cc] sm:$0xf] }
 0x134   : > { %2569 = vmatpush.bf16.msrb.mxu3 %v3822_v60  ;;  %2637 = vst [vmem:[#allocation2 + $0x10] sm:$0xff] %v2633_v34  ;;  %v5970_v57 = vpop.f32.mrf.mxu3  ;;  %v4587_v60 = vld [vmem:[%s5371_s27 + $0x22c] sm:$0xf]  ;;  %v4219_v34 = vld [vmem:[%s5371_s27 + $0x7f8] sm:$0xf0]  ;;  %v4350_v52 = vor.u32 %v4803_v37, %v4347_v38 }
 0x135   : > { %2531 = vmatpush.bf16.msrb.mxu0 %v3422_v47  ;;  %v4651_v47 = vld [vmem:[%s5371_s27 + $0x42c] sm:$0xf]  ;;  %v3486_v14 = vor.u32 %v4587_v60, %v3483_v6  ;;  %v3947_v48 = vld [vmem:[%s5371_s27 + $0x5d8] sm:$0xf0] }
 0x136   : > { %v4203_v53 = vld [vmem:[%s5371_s27 + $0x7d8] sm:$0xf0]  ;;  %v4763_v3 = vld [vmem:[%s5371_s27 + $0x7ac] sm:$0xf] }
 0x137   : > { %2544 = vmatpush.bf16.msrb.mxu1 %v3550_v10  ;;  %2557 = vmatpush.bf16.msrb.mxu2 %v3678_v11  ;;  %v3739_v10 = vld [vmem:[%s5371_s27 + $0x438] sm:$0xf0]  ;;  %v3358_v11 = vor.u32 %v4555_v0, %v3355_v2  ;;  %v4731_v0 = vld [vmem:[%s5371_s27 + $0x6ac] sm:$0xf] }
 0x138   : > { %2570 = vmatpush.bf16.msrb.mxu3 %v3806_v16  ;;  %v4583_v16 = vld [vmem:[%s5371_s27 + $0x20c] sm:$0xf]  ;;  %v3742_v18 = vor.u32 %v4651_v47, %v3739_v10  ;;  %v4331_v58 = vld [vmem:[%s5371_s27 + $0x8d8] sm:$0xf0] }
 0x139   : > { %2532 = vmatpush.bf16.msrb.mxu0 %v3406_v27  ;;  %v2306_v25 = vpop.f32.mrf.mxu2  ;;  %v4707_v27 = vld [vmem:[%s5371_s27 + $0x5ec] sm:$0xf]  ;;  %v4334_v2 = vor.u32 %v4799_v55, %v4331_v58  ;;  %v4059_v60 = vld [vmem:[%s5371_s27 + $0x6b8] sm:$0xf0] }
 0x13a   : > { %v4795_v6 = vld [vmem:[%s5371_s27 + $0x8ac] sm:$0xf]  ;;  %v4315_v8 = vld [vmem:[%s5371_s27 + $0x8b8] sm:$0xf0]  ;;  %v4062_v9 = vor.u32 %v4731_v0, %v4059_v60 }
 0x13b   : > { %2545 = vmatpush.bf16.msrb.mxu1 %v3534_v50  ;;  %2558 = vmatpush.bf16.msrb.mxu2 %v3662_v28  ;;  %v3963_v50 = vld [vmem:[%s5371_s27 + $0x5f8] sm:$0xf0]  ;;  %v4739_v28 = vld [vmem:[%s5371_s27 + $0x6ec] sm:$0xf] }
 0x13c   : > { %2571 = vmatpush.bf16.msrb.mxu3 %v3790_v35  ;;  %v2319_v26 = vpop.f32.mrf.mxu3  ;;  %v3470_v35 = vor.u32 %v4583_v16, %v3467_v17  ;;  %v3966_v23 = vor.u32 %v4707_v27, %v3963_v50  ;;  %v4695_v10 = vld [vmem:[%s5371_s27 + $0x58c] sm:$0xf]  ;;  %v4043_v12 = vld [vmem:[%s5371_s27 + $0x698] sm:$0xf0] }
 0x13d   : > { %2533 = vmatpush.bf16.msrb.mxu0 %v3390_v41  ;;  %v4094_v41 = vor.u32 %v4739_v28, %v4091_v31  ;;  %v4691_v21 = vld [vmem:[%s5371_s27 + $0x56c] sm:$0xf]  ;;  %v3899_v19 = vld [vmem:[%s5371_s27 + $0x578] sm:$0xf0] }
 0x13e   : > { %v4723_v24 = vld [vmem:[%s5371_s27 + $0x66c] sm:$0xf]  ;;  %v4027_v27 = vld [vmem:[%s5371_s27 + $0x678] sm:$0xf0] }
 0x13f   : > { %2546 = vmatpush.bf16.msrb.mxu1 %v3518_v44  ;;  %2559 = vmatpush.bf16.msrb.mxu2 %v3646_v46  ;;  %v4222_v44 = vor.u32 %v4771_v32, %v4219_v34  ;;  %v4703_v46 = vld [vmem:[%s5371_s27 + $0x5cc] sm:$0xf]  ;;  %v4155_v28 = vld [vmem:[%s5371_s27 + $0x778] sm:$0xf0]  ;;  %v3902_v32 = vor.u32 %v4691_v21, %v3899_v19  ;;  %v4030_v34 = vor.u32 %v4723_v24, %v4027_v27 }
 0x140   : > { %2572 = vmatpush.bf16.msrb.mxu3 %v3774_v54  ;;  %v4075_v54 = vld [vmem:[%s5371_s27 + $0x6d8] sm:$0xf0]  ;;  %v3950_v59 = vor.u32 %v4703_v46, %v3947_v48  ;;  %v4755_v50 = vld [vmem:[%s5371_s27 + $0x76c] sm:$0xf] }
 0x141   : > { %2534 = vmatpush.bf16.msrb.mxu0 %v3374_v61  ;;  %v4078_v29 = vor.u32 %v4735_v49, %v4075_v54  ;;  %v4206_v61 = vor.u32 %v4767_v51, %v4203_v53  ;;  %v4283_v31 = vld [vmem:[%s5371_s27 + $0x878] sm:$0xf0]  ;;  %v4719_v38 = vld [vmem:[%s5371_s27 + $0x64c] sm:$0xf]  ;;  %v2305_v54 = vadd.f32 %v5968_v56, %v5955_v33 }
 0x142   : > { %v3883_v37 = vld [vmem:[%s5371_s27 + $0x558] sm:$0xf0]  ;;  %v4783_v49 = vld [vmem:[%s5371_s27 + $0x84c] sm:$0xf] }
 0x143   : > { %2547 = vmatpush.bf16.msrb.mxu1 %v3502_v62  ;;  %2560 = vmatpush.bf16.msrb.mxu2 %v3630_v63  ;;  %v4699_v62 = vld [vmem:[%s5371_s27 + $0x5ac] sm:$0xf]  ;;  %v3931_v63 = vld [vmem:[%s5371_s27 + $0x5b8] sm:$0xf0] }
 0x144   : > { %2573 = vmatpush.bf16.msrb.mxu3 %v3758_v4  ;;  %v4187_v4 = vld [vmem:[%s5371_s27 + $0x7b8] sm:$0xf0]  ;;  %v4747_v56 = vld [vmem:[%s5371_s27 + $0x72c] sm:$0xf] }
 0x145   : > { %2535 = vmatpush.bf16.msrb.mxu0 %v3358_v11  ;;  %v4190_v47 = vor.u32 %v4763_v3, %v4187_v4  ;;  %v3915_v11 = vld [vmem:[%s5371_s27 + $0x598] sm:$0xf0]  ;;  %v2318_v3 = vadd.f32 %v5970_v57, %v2305_v54 }
 0x146   : > { %v3918_v16 = vor.u32 %v4695_v10, %v3915_v11  ;;  %v4139_v46 = vld [vmem:[%s5371_s27 + $0x758] sm:$0xf0] }
 0x147   : > { %2548 = vmatpush.bf16.msrb.mxu1 %v3486_v14  ;;  %2561 = vmatpush.bf16.msrb.mxu2 %v3614_v15  ;;  %v4171_v14 = vld [vmem:[%s5371_s27 + $0x798] sm:$0xf0]  ;;  %v4791_v15 = vld [vmem:[%s5371_s27 + $0x88c] sm:$0xf] }
 0x148   : > { %2574 = vmatpush.bf16.msrb.mxu3 %v3742_v18  ;;  %v4174_v18 = vor.u32 %v4759_v13, %v4171_v14  ;;  %v3995_v33 = vld [vmem:[%s5371_s27 + $0x638] sm:$0xf0]  ;;  %v4775_v14 = vld [vmem:[%s5371_s27 + $0x80c] sm:$0xf] }
 0x149   : > { %2536 = vmatpush.bf16.msrb.mxu0 %v3342_v30  ;;  %v6026_v17 = vpop.f32.mrf.mxu0  ;;  %v4787_v30 = vld [vmem:[%s5371_s27 + $0x86c] sm:$0xf]  ;;  %v4123_v0 = vld [vmem:[%s5371_s27 + $0x738] sm:$0xf0] }
 0x14a   : > { %v4251_v60 = vld [vmem:[%s5371_s27 + $0x838] sm:$0xf0] }
 0x14b   : > { %2549 = vmatpush.bf16.msrb.mxu1 %v3470_v35  ;;  %2562 = vmatpush.bf16.msrb.mxu2 %v3598_v36  ;;  %v6031_v25 = vpop.f32.mrf.mxu1  ;;  %v4158_v35 = vor.u32 %v4755_v50, %v4155_v28  ;;  %v4687_v36 = vld [vmem:[%s5371_s27 + $0x54c] sm:$0xf]  ;;  %v4235_v57 = vld [vmem:[%s5371_s27 + $0x818] sm:$0xf0]  ;;  %v397_v50 = vld [vmem:[#allocation2] sm:$0xff] }
 0x14c   : > { %2575 = vmatpush.bf16.msrb.mxu3 %v3726_v40  ;;  %2537 = vmatmul.bf16.vlgmr.msrb.gmra.mxu0 %v5503_v22  ;;  %v4727_v22 = vld [vmem:[%s5371_s27 + $0x68c] sm:$0xf]  ;;  %v3886_v51 = vor.u32 %v4687_v36, %v3883_v37 }
 0x14d   : > { %2581 = vmatpush.bf16.msra.mxu0 %v3966_v23  ;;  %v4046_v1 = vor.u32 %v4727_v22, %v4043_v12  ;;  %v4286_v23 = vor.u32 %v4787_v30, %v4283_v31  ;;  %v3979_v22 = vld [vmem:[%s5371_s27 + $0x618] sm:$0xf0] }
 0x14e   : > { %2563 = vmatmul.bf16.vlgmr.msrb.gmra.mxu2 %v5489_v7  ;;  %2550 = vmatmul.bf16.vlgmr.msrb.gmra.mxu1 %v5486_v5  ;;  %v3934_v7 = vor.u32 %v4699_v62, %v3931_v63  ;;  %v4299_v5 = vld [vmem:[%s5371_s27 + $0x898] sm:$0xf0] }
 0x14f   : > { %2594 = vmatpush.bf16.msra.mxu1 %v4094_v41  ;;  %2607 = vmatpush.bf16.msra.mxu2 %v4222_v44  ;;  %v4302_v26 = vor.u32 %v4791_v15, %v4299_v5  ;;  %v4011_v41 = vld [vmem:[%s5371_s27 + $0x658] sm:$0xf0]  ;;  %v4751_v44 = vld [vmem:[%s5371_s27 + $0x74c] sm:$0xf]  ;;  %v2331_v15 = vadd.f32 %v6026_v17, %v2318_v3 }
 0x150   : > { %2620 = vmatpush.bf16.msra.mxu3 %v4350_v52  ;;  %v4267_v52 = vld [vmem:[%s5371_s27 + $0x858] sm:$0xf0]  ;;  %v4014_v55 = vor.u32 %v4719_v38, %v4011_v41  ;;  %v4142_v58 = vor.u32 %v4751_v44, %v4139_v46 }
 0x151   : > { %2576 = vmatmul.bf16.vlgmr.msrb.gmra.mxu3 %v5559_v42  ;;  %2582 = vmatpush.bf16.msra.mxu0 %v3950_v59  ;;  %v4318_v42 = vor.u32 %v4795_v6, %v4315_v8  ;;  %v2356_v40 = vpop.f32.mrf.mxu2  ;;  %v2332_v53 = vpop.f32.mrf.mxu0  ;;  %v4683_v59 = vld [vmem:[%s5371_s27 + $0x52c] sm:$0xf]  ;;  %v4270_v63 = vor.u32 %v4783_v49, %v4267_v52  ;;  %v4126_v8 = vor.u32 %v4747_v56, %v4123_v0  ;;  %v4107_v12 = vld [vmem:[%s5371_s27 + $0x718] sm:$0xf0] }
 0x152   : > { %v2344_v21 = vadd.f32 %v6031_v25, %v2331_v15 }
 0x153   : > { %2595 = vmatpush.bf16.msra.mxu1 %v4078_v29  ;;  %2608 = vmatpush.bf16.msra.mxu2 %v4206_v61  ;;  %v3867_v29 = vld [vmem:[%s5371_s27 + $0x538] sm:$0xf0]  ;;  %v4715_v61 = vld [vmem:[%s5371_s27 + $0x62c] sm:$0xf]  ;;  %v2345_v62 = vpop.f32.mrf.mxu1 }
 0x154   : > { %2621 = vmatpush.bf16.msra.mxu3 %v4334_v2  ;;  %v2369_v48 = vpop.f32.mrf.mxu3  ;;  %v4779_v2 = vld [vmem:[%s5371_s27 + $0x82c] sm:$0xf]  ;;  %v3870_v4 = vor.u32 %v4683_v59, %v3867_v29  ;;  %v3998_v6 = vor.u32 %v4715_v61, %v3995_v33  ;;  %v2357_v19 = vadd.f32 %v2356_v40, %v2344_v21 }
 0x155   : > { %2583 = vmatpush.bf16.msra.mxu0 %v3934_v7  ;;  %v4679_v7 = vld [vmem:[%s5371_s27 + $0x50c] sm:$0xf]  ;;  %v4254_v11 = vor.u32 %v4779_v2, %v4251_v60 }
 0x156   : > { %v2370_v17 = vadd.f32 %v2369_v48, %v2357_v19 }
 0x157   : > { %2596 = vmatpush.bf16.msra.mxu1 %v4062_v9  ;;  %2609 = vmatpush.bf16.msra.mxu2 %v4190_v47  ;;  %v3851_v9 = vld [vmem:[%s5371_s27 + $0x518] sm:$0xf0]  ;;  %v4711_v47 = vld [vmem:[%s5371_s27 + $0x60c] sm:$0xf] }
 0x158   : > { %2622 = vmatpush.bf16.msra.mxu3 %v4318_v42  ;;  %v4743_v42 = vld [vmem:[%s5371_s27 + $0x70c] sm:$0xf]  ;;  %v3854_v5 = vor.u32 %v4679_v7, %v3851_v9 }
 0x159   : > { %2584 = vmatpush.bf16.msra.mxu0 %v3918_v16  ;;  %v2358_v10 = vpop.f32.mrf.mxu2  ;;  %v3982_v16 = vor.u32 %v4711_v47, %v3979_v22 }
 0x15b   : > { %2597 = vmatpush.bf16.msra.mxu1 %v4046_v1  ;;  %2610 = vmatpush.bf16.msra.mxu2 %v4174_v18  ;;  %v4110_v1 = vor.u32 %v4743_v42, %v4107_v12  ;;  %v4238_v18 = vor.u32 %v4775_v14, %v4235_v57 }
 0x15c   : > { %2623 = vmatpush.bf16.msra.mxu3 %v4302_v26  ;;  %v2371_v13 = vpop.f32.mrf.mxu3 }
 0x15d   : > { %2585 = vmatpush.bf16.msra.mxu0 %v3902_v32 }
 0x15f   : > { %2598 = vmatpush.bf16.msra.mxu1 %v4030_v34  ;;  %2611 = vmatpush.bf16.msra.mxu2 %v4158_v35 }
 0x160   : > { %2624 = vmatpush.bf16.msra.mxu3 %v4286_v23 }
 0x161   : > { %2586 = vmatpush.bf16.msra.mxu0 %v3886_v51 }
 0x163   : > { %2599 = vmatpush.bf16.msra.mxu1 %v4014_v55  ;;  %2612 = vmatpush.bf16.msra.mxu2 %v4142_v58  ;;  %v398_v55 = vld [vmem:[#allocation2 + $0x18] sm:$0xff] }
 0x164   : > { %2625 = vmatpush.bf16.msra.mxu3 %v4270_v63 }
 0x165   : > { %2587 = vmatpush.bf16.msra.mxu0 %v3870_v4 }
 0x167   : > { %2600 = vmatpush.bf16.msra.mxu1 %v3998_v6  ;;  %2613 = vmatpush.bf16.msra.mxu2 %v4126_v8 }
 0x168   : > { %2626 = vmatpush.bf16.msra.mxu3 %v4254_v11 }
 0x169   : > { %2588 = vmatpush.bf16.msra.mxu0 %v3854_v5  ;;  %v2382_v24 = vpop.f32.mrf.mxu0 }
 0x16a   : > { %v2383_v26 = vadd.f32 %v2382_v24, %v2370_v17 }
 0x16b   : > { %2601 = vmatpush.bf16.msra.mxu1 %v3982_v16  ;;  %2614 = vmatpush.bf16.msra.mxu2 %v4110_v1  ;;  %v2395_v27 = vpop.f32.mrf.mxu1  ;;  %v399_v16 = vld [vmem:[#allocation2 + $0x8] sm:$0xff] }
 0x16c   : > { %2627 = vmatpush.bf16.msra.mxu3 %v4238_v18  ;;  %2589 = vmatmul.bf16.vlgmr.msra.gmra.mxu0 %v5563_v45  ;;  %v2396_v28 = vadd.f32 %v2395_v27, %v2383_v26 }
 0x16e   : > { %2602 = vmatmul.bf16.vlgmr.msra.gmra.mxu1 %v5555_v39  ;;  %2615 = vmatmul.bf16.vlgmr.msra.gmra.mxu2 %v5561_v43  ;;  %v2634_v25 = vadd.f32 %v2396_v28, %v397_v50 }
 0x16f   : > { %2628 = vmatmul.bf16.vlgmr.msra.gmra.mxu3 %v5629_v20 }
 0x170   : > { %2638 = vst [vmem:[#allocation2] sm:$0xff] %v2634_v25 }
 0x171   : > { %v2408_v30 = vpop.f32.mrf.mxu2  ;;  %v2384_v32 = vpop.f32.mrf.mxu0 }
 0x173   : > { %v2397_v34 = vpop.f32.mrf.mxu1 }
 0x174   : > { %v2421_v31 = vpop.f32.mrf.mxu3 }
 0x175   : > { %v2422_v40 = vadd.f32 %v2421_v31, %v2408_v30 }
 0x179   : > { %v2410_v45 = vpop.f32.mrf.mxu2 }
 0x17c   : > { %v2423_v35 = vpop.f32.mrf.mxu3 }
 0x189   : > { %v2434_v36 = vpop.f32.mrf.mxu0 }
 0x18a   : > { %v2435_v44 = vadd.f32 %v2434_v36, %v2422_v40 }
 0x18b   : > { %v2447_v39 = vpop.f32.mrf.mxu1 }
 0x18c   : > { %v2448_v46 = vadd.f32 %v2447_v39, %v2435_v44 }
 0x191   : > { %v2460_v37 = vpop.f32.mrf.mxu2  ;;  %v2436_v38 = vpop.f32.mrf.mxu0 }
 0x192   : > { %v2461_v48 = vadd.f32 %v2460_v37, %v2448_v46 }
 0x193   : > { %v2449_v20 = vpop.f32.mrf.mxu1 }
 0x194   : > { %v2473_v43 = vpop.f32.mrf.mxu3 }
 0x195   : > { %v2474_v49 = vadd.f32 %v2473_v43, %v2461_v48 }
 0x199   : > { %v2462_v23 = vpop.f32.mrf.mxu2 }
 0x19c   : > { %v2475_v41 = vpop.f32.mrf.mxu3 }
 0x1a9   : > { %v2486_v52 = vpop.f32.mrf.mxu0 }
 0x1aa   : > { %v2487_v51 = vadd.f32 %v2486_v52, %v2474_v49 }
 0x1ab   : > { %v2499_v54 = vpop.f32.mrf.mxu1 }
 0x1ac   : > { %v2500_v53 = vadd.f32 %v2499_v54, %v2487_v51 }
 0x1b1   : > { %v2512_v58 = vpop.f32.mrf.mxu2  ;;  %v2488_v61 = vpop.f32.mrf.mxu0 }
 0x1b2   : > { %v2513_v59 = vadd.f32 %v2512_v58, %v2500_v53 }
 0x1b3   : > { %v2501_v62 = vpop.f32.mrf.mxu1 }
 0x1b4   : > { %v2525_v29 = vpop.f32.mrf.mxu3  ;;  %v2635_v63 = vadd.f32 %v2513_v59, %v398_v55 }
 0x1b6   : > { %2639 = vst [vmem:[#allocation2 + $0x18] sm:$0xff] %v2635_v63 }
 0x1b9   : > { %v2514_v33 = vpop.f32.mrf.mxu2 }
 0x1bc   : > { %v2527_v56 = vpop.f32.mrf.mxu3 }
 0x1c9   : > { %v2538_v0 = vpop.f32.mrf.mxu0 }
 0x1ca   : > { %v2539_v9 = vadd.f32 %v2538_v0, %v2525_v29 }
 0x1cb   : > { %v2551_v2 = vpop.f32.mrf.mxu1 }
 0x1cc   : > { %v2552_v47 = vadd.f32 %v2551_v2, %v2539_v9 }
 0x1d1   : > { %v2564_v60 = vpop.f32.mrf.mxu2  ;;  %v2540_v4 = vpop.f32.mrf.mxu0 }
 0x1d2   : > { %v2565_v10 = vadd.f32 %v2564_v60, %v2552_v47 }
 0x1d3   : > { %v2553_v6 = vpop.f32.mrf.mxu1 }
 0x1d4   : > { %v2577_v3 = vpop.f32.mrf.mxu3 }
 0x1d5   : > { %v2578_v11 = vadd.f32 %v2577_v3, %v2565_v10 }
 0x1d9   : > { %v2566_v8 = vpop.f32.mrf.mxu2 }
 0x1dc   : > { %v2579_v7 = vpop.f32.mrf.mxu3 }
 0x1e9   : > { %v2590_v22 = vpop.f32.mrf.mxu0 }
 0x1ea   : > { %v2591_v12 = vadd.f32 %v2590_v22, %v2578_v11 }
 0x1eb   : > { %v2603_v42 = vpop.f32.mrf.mxu1 }
 0x1ec   : > { %v2604_v13 = vadd.f32 %v2603_v42, %v2591_v12 }
 0x1f1   : > { %v2616_v14 = vpop.f32.mrf.mxu2  ;;  %v2592_v5 = vpop.f32.mrf.mxu0 }
 0x1f2   : > { %v2617_v57 = vadd.f32 %v2616_v14, %v2604_v13  ;;  %v2629_v15 = vpop.f32.mrf.mxu3 }
 0x1f3   : > { %v2605_v1 = vpop.f32.mrf.mxu1 }
 0x1f4   : > { %v2630_v18 = vadd.f32 %v2629_v15, %v2617_v57 }
 0x1f6   : > { %v2636_v21 = vadd.f32 %v2630_v18, %v399_v16  ;;  %2644 = sbr.rel (%p4351_p1) target bundleno = 813 (0x32d), region = 80 }
 0x1f8   : > { %2640 = vst [vmem:[#allocation2 + $0x8] sm:$0xff] %v2636_v21 }
 0x1f9   : > { %v2618_v19 = vpop.f32.mrf.mxu2 }
 0x1fa   : > { %v2631_v17 = vpop.f32.mrf.mxu3 }
 0x1fb   : > { %v4813_v24 = vld [vmem:[#allocation8 + $0x38] sm:$0xff]  ;;  %v4812_v28 = vld [vmem:[#allocation8 + $0x30] sm:$0xff]  ;;  %v4811_v32 = vld [vmem:[#allocation8 + $0x28] sm:$0xff] }
 0x1fc   : > { %v4821_v26 = vld [vmem:[#allocation8 + $0x78] sm:$0xff]  ;;  %2927 = vmatpush.bf16.msra.mxu0 %v4813_v24  ;;  %v4820_v25 = vld [vmem:[#allocation8 + $0x70] sm:$0xff]  ;;  %v4819_v34 = vld [vmem:[#allocation8 + $0x68] sm:$0xff] }
 0x1fd   : > { %v4829_v27 = vld [vmem:[#allocation8 + $0xb8] sm:$0xff]  ;;  %2940 = vmatpush.bf16.msra.mxu1 %v4821_v26  ;;  %v4828_v30 = vld [vmem:[#allocation8 + $0xb0] sm:$0xff]  ;;  %v4827_v45 = vld [vmem:[#allocation8 + $0xa8] sm:$0xff] }
 0x1fe   : > { %v4837_v50 = vld [vmem:[#allocation8 + $0xf8] sm:$0xff]  ;;  %2953 = vmatpush.bf16.msra.mxu2 %v4829_v27  ;;  %v4836_v31 = vld [vmem:[#allocation8 + $0xf0] sm:$0xff]  ;;  %v4835_v35 = vld [vmem:[#allocation8 + $0xe8] sm:$0xff] }
 0x1ff   : > { %2966 = vmatpush.bf16.msra.mxu3 %v4837_v50  ;;  %v4810_v36 = vld [vmem:[#allocation8 + $0x20] sm:$0xff]  ;;  %v4809_v38 = vld [vmem:[#allocation8 + $0x18] sm:$0xff]  ;;  %v4808_v41 = vld [vmem:[#allocation8 + $0x10] sm:$0xff] }
 0x200   : > { %2928 = vmatpush.bf16.msra.mxu0 %v4812_v28  ;;  %v4818_v39 = vld [vmem:[#allocation8 + $0x60] sm:$0xff]  ;;  %v4817_v20 = vld [vmem:[#allocation8 + $0x58] sm:$0xff]  ;;  %v4816_v44 = vld [vmem:[#allocation8 + $0x50] sm:$0xff] }
 0x201   : > { %2941 = vmatpush.bf16.msra.mxu1 %v4820_v25  ;;  %v4826_v37 = vld [vmem:[#allocation8 + $0xa0] sm:$0xff]  ;;  %v4825_v40 = vld [vmem:[#allocation8 + $0x98] sm:$0xff]  ;;  %v4824_v48 = vld [vmem:[#allocation8 + $0x90] sm:$0xff] }
 0x202   : > { %2954 = vmatpush.bf16.msra.mxu2 %v4828_v30  ;;  %v4834_v43 = vld [vmem:[#allocation8 + $0xe0] sm:$0xff]  ;;  %v4833_v23 = vld [vmem:[#allocation8 + $0xd8] sm:$0xff]  ;;  %v4832_v49 = vld [vmem:[#allocation8 + $0xd0] sm:$0xff] }
 0x203   : > { %2967 = vmatpush.bf16.msra.mxu3 %v4836_v31  ;;  %v2649_v46 = vld [vmem:[#allocation6] sm:$0xf]  ;;  %v4807_v52 = vld [vmem:[#allocation8 + $0x8] sm:$0xff]  ;;  %v2647_v63 = vld [vmem:[#allocation2 + $0x18] sm:$0xff] }
 0x204   : > { %2929 = vmatpush.bf16.msra.mxu0 %v4811_v32  ;;  %v4815_v54 = vld [vmem:[#allocation8 + $0x48] sm:$0xff]  ;;  %v2651_v51 = vperm.slane %v2649_v46, 0  ;;  %v2652_v53 = vperm.slane %v2649_v46, 1  ;;  %v2646_v59 = vld [vmem:[#allocation2] sm:$0xff]  ;;  %v2653_v29 = vperm.slane %v2649_v46, 2  ;;  %v2654_v61 = vperm.slane %v2649_v46, 3 }
 0x205   : > { %2942 = vmatpush.bf16.msra.mxu1 %v4819_v34  ;;  %v4823_v55 = vld [vmem:[#allocation8 + $0x88] sm:$0xff]  ;;  %v4806_v2 = vld [vmem:[#allocation8] sm:$0xff]  ;;  %v4844_v22 = vld [vmem:[#allocation11 + $0x30] sm:$0xff] }
 0x206   : > { %2955 = vmatpush.bf16.msra.mxu2 %v4827_v45  ;;  %v2645_v58 = vld [vmem:[#allocation2 + $0x10] sm:$0xff]  ;;  %v2648_v33 = vld [vmem:[#allocation2 + $0x8] sm:$0xff]  ;;  %v2660_v0 = vadd.f32 %v2652_v53, %v2646_v59  ;;  %v2661_v3 = vadd.f32 %v2653_v29, %v2647_v63  ;;  %v4845_v7 = vld [vmem:[#allocation11 + $0x38] sm:$0xff] }
 0x207   : > { %2968 = vmatpush.bf16.msra.mxu3 %v4835_v35  ;;  %v4831_v62 = vld [vmem:[#allocation8 + $0xc8] sm:$0xff]  ;;  %v2659_v56 = vadd.f32 %v2651_v51, %v2645_v58  ;;  %v4814_v60 = vld [vmem:[#allocation8 + $0x40] sm:$0xff]  ;;  %v2662_v4 = vadd.f32 %v2654_v61, %v2648_v33  ;;  %v4840_v14 = vld [vmem:[#allocation11 + $0x10] sm:$0xff] }
 0x208   : > { %2930 = vmatpush.bf16.msra.mxu0 %v4810_v36  ;;  %v4822_v6 = vld [vmem:[#allocation8 + $0x80] sm:$0xff]  ;;  %v2664_v47 = vpack.c.bf16 %v2660_v0, %v2660_v0  ;;  %v2665_v10 = vpack.c.bf16 %v2661_v3, %v2661_v3  ;;  %v4843_v42 = vld [vmem:[#allocation11 + $0x28] sm:$0xff] }
 0x209   : > { %2943 = vmatpush.bf16.msra.mxu1 %v4818_v39  ;;  %v4830_v8 = vld [vmem:[#allocation8 + $0xc0] sm:$0xff]  ;;  %v2663_v9 = vpack.c.bf16 %v2659_v56, %v2659_v56  ;;  %v2666_v11 = vpack.c.bf16 %v2662_v4, %v2662_v4  ;;  %v4839_v57 = vld [vmem:[#allocation11 + $0x8] sm:$0xff] }
 0x20a   : > { %2956 = vmatpush.bf16.msra.mxu2 %v4826_v37  ;;  %v4842_v12 = vld [vmem:[#allocation11 + $0x20] sm:$0xff]  ;;  %v4841_v13 = vld [vmem:[#allocation11 + $0x18] sm:$0xff] }
 0x20b   : > { %2969 = vmatpush.bf16.msra.mxu3 %v4834_v43  ;;  %v4838_v15 = vld [vmem:[#allocation11] sm:$0xff]  ;;  %v4951_v5 = vld [vmem:[#allocation9] ss:$0 sm:$0xff] }
 0x20c   : > { %2931 = vmatpush.bf16.msra.mxu0 %v4809_v38  ;;  %v4952_v31 = vld [vmem:[#allocation12] ss:$0 sm:$0xff] }
 0x20d   : > { %2944 = vmatpush.bf16.msra.mxu1 %v4817_v20 }
 0x20e   : > { %2957 = vmatpush.bf16.msra.mxu2 %v4825_v40 }
 0x20f   : > { %2970 = vmatpush.bf16.msra.mxu3 %v4833_v23 }
 0x210   : > { %2932 = vmatpush.bf16.msra.mxu0 %v4808_v41 }
 0x211   : > { %2945 = vmatpush.bf16.msra.mxu1 %v4816_v44 }
 0x212   : > { %2958 = vmatpush.bf16.msra.mxu2 %v4824_v48 }
 0x213   : > { %2971 = vmatpush.bf16.msra.mxu3 %v4832_v49 }
 0x214   : > { %2933 = vmatpush.bf16.msra.mxu0 %v4807_v52 }
 0x215   : > { %2946 = vmatpush.bf16.msra.mxu1 %v4815_v54 }
 0x216   : > { %2959 = vmatpush.bf16.msra.mxu2 %v4823_v55 }
 0x217   : > { %2972 = vmatpush.bf16.msra.mxu3 %v4831_v62 }
 0x218   : > { %2934 = vmatpush.bf16.msra.mxu0 %v4806_v2 }
 0x219   : > { %2947 = vmatpush.bf16.msra.mxu1 %v4814_v60 }
 0x21a   : > { %2960 = vmatpush.bf16.msra.mxu2 %v4822_v6 }
 0x21b   : > { %2973 = vmatpush.bf16.msra.mxu3 %v4830_v8  ;;  %2935 = vmatmul.bf16.vlgmr.msra.gmra.mxu0 %v2663_v9 }
 0x21c   : > { %3048 = vmatpush.bf16.msrb.mxu0 %v4845_v7  ;;  %2948 = vmatmul.bf16.vlgmr.msra.gmra.mxu1 %v2664_v47 }
 0x21d   : > { %2961 = vmatmul.bf16.vlgmr.msra.gmra.mxu2 %v2665_v10 }
 0x21e   : > { %2974 = vmatmul.bf16.vlgmr.msra.gmra.mxu3 %v2666_v11 }
 0x220   : > { %3049 = vmatpush.bf16.msrb.mxu0 %v4844_v22 }
 0x224   : > { %3050 = vmatpush.bf16.msrb.mxu0 %v4843_v42 }
 0x228   : > { %3051 = vmatpush.bf16.msrb.mxu0 %v4842_v12 }
 0x22c   : > { %3052 = vmatpush.bf16.msrb.mxu0 %v4841_v13 }
 0x230   : > { %3053 = vmatpush.bf16.msrb.mxu0 %v4840_v14 }
 0x234   : > { %3054 = vmatpush.bf16.msrb.mxu0 %v4839_v57 }
 0x238   : > { %3055 = vmatpush.bf16.msrb.mxu0 %v4838_v15 }
 0x298   : > { %v2936_v16 = vpop.f32.mrf.mxu0 }
 0x299   : > { %v2949_v1 = vpop.f32.mrf.mxu1  ;;  %v2937_v18 = vadd.f32 %v4951_v5, %v2936_v16 }
 0x29b   : > { %v2950_v21 = vadd.f32 %v2949_v1, %v2937_v18 }
 0x2a0   : > { %v2962_v19 = vpop.f32.mrf.mxu2  ;;  %v2938_v26 = vpop.f32.mrf.mxu0 }
 0x2a1   : > { %v2975_v17 = vpop.f32.mrf.mxu3  ;;  %v2963_v24 = vadd.f32 %v2962_v19, %v2950_v21  ;;  %v2951_v27 = vpop.f32.mrf.mxu1 }
 0x2a3   : > { %v2976_v50 = vadd.f32 %v2975_v17, %v2963_v24 }
 0x2a5   : > { %v2979_v28 = vpack.c.bf16 %v2976_v50, %v2976_v50 }
 0x2a7   : > { %3056 = vmatmul.bf16.vlgmr.msrb.gmra.mxu0 %v2979_v28 }
 0x2a8   : > { %v2964_v25 = vpop.f32.mrf.mxu2 }
 0x2a9   : > { %v2977_v30 = vpop.f32.mrf.mxu3 }
 0x324   : > { %v3057_v32 = vpop.f32.mrf.mxu0 }
 0x325   : > { %v3058_v34 = vadd.f32 %v4952_v31, %v3057_v32 }
 0x327   : > { %3061 = vst [vmem:[#allocation14] sm:$0xff] %v3058_v34 }
 0x32c   : > { %v3059_v45 = vpop.f32.mrf.mxu0 }
 0x32d PF: > { %p4906_p3 = scmp.eq.s32.totalorder %s5288_s8, 3  ;;  %s5223_s16 = smov [#allocation14]  }
 0x32e   : > { %s3068_s17 = sshll.u32 %s5223_s16, 4  ;;  %s3070_s21 = sshll.u32 %s6096_s7, 4  ;;  %s3069_s17 = int_to_ptr.vmem [resolvable:$true] %s3068_s17  ;;  %s3071_s21 = int_to_ptr.hbm [resolvable:$true] %s3070_s21 }
 0x32f   : > { %4872 = dma.vmem_to_hbm [thread:$0]  (%p4906_p3), %s3069_s17, 128, %s3071_s21, [#allocation5]  }
 0x330   : > { %5194 = dma.done.wait (%p4906_p3), [#allocation5], 128  }
 0x331   : > { %5196 = vsyncadd (%p4906_p3), [#allocation5], 4294967168 }
 0x332 PF: > { %p21_p12 = scmp.ge.s32.totalorder %s5329_s19, 6   ;;  %s6101_s24 = smov %s5203_s25 }
 0x333   : > { %s6102_s25 = smov %s5207_s26  ;;  %s6103_s26 = smov %s5340_s22 }
 0x334   : > { %s6104_s27 = smov %s5329_s19  ;;  %23 = sbr.rel (!%p21_p12) target bundleno = 7 (0x7), region = 116 }
 0x339   :  { %3084 = vsyncpa [#allocation4], 1 }
 0x33a   :  { %3086 = vsyncpa [#allocation4 + $0x1], 1 }
 0x33b   :  { %3087 = vsyncpa [#allocation7], 1 }
 0x33c   :  { %3088 = vsyncpa [#allocation10], 1 }
 0x33d   :  { %3089 = vsyncpa [#allocation13], 1 }
 0x33e   :  { %3090 = vsyncpa [#allocation5], 1 }
 0x33f   :  { %3092 = vsyncpa [#allocation5 + $0x1], 1 }

</bundles_post_ra>
